<compile_context>
chip_gen: v5e
topology: v5e:2x2
jax: 0.10.0
libtpu: 0.0.40
codegen_flags: <defaults>
</compile_context>

<pallas_src>
import functools

import jax
import jax.numpy as jnp
from jax import lax
from jax.experimental import pallas as pl
from jax.experimental.pallas import tpu as pltpu

START_TAG = "<START>"
STOP_TAG = "<STOP>"


# ---------------------------------------------------------------------------
# Fused kernel: embedding gather + packed bi-LSTM + hidden2tag + Viterbi decode
# ---------------------------------------------------------------------------
def _fused_forward_kernel(ids_ref, emb_ref, win_ref, whh_ref, b_ref, h0_ref,
                          c0_ref, wtag_ref, btag_ref, trans_ref,
                          path_ref, score_ref, start_ref, *, start_idx, stop_idx):
    # ids_ref:  (T,) int32 in SMEM (token ids)
    # emb_ref:  (V, E)        win_ref: (E, 8H)    whh_ref: (2H, 8H) block-diagonal
    # b_ref:    (1, 8H)       h0_ref/c0_ref: (1, 2H) packed [fwd | bwd]
    # wtag_ref: (2H, K)       btag_ref: (1, K)    trans_ref: (K, K) trans[next, prev]
    # outputs:  path_ref (1, T) i32, score_ref (1, 1) f32, start_ref (1, 1) i32
    T = path_ref.shape[1]
    H2 = h0_ref.shape[1]          # 2H
    H = H2 // 2
    G = win_ref.shape[1]          # 8H, gate layout [i_f,i_b | f_f,f_b | g_f,g_b | o_f,o_b]
    K = trans_ref.shape[0]

    # ---- embedding gather: ids are SMEM scalars, table stays in VMEM ----
    x = jnp.concatenate(
        [emb_ref[pl.ds(ids_ref[t], 1), :] for t in range(T)], axis=0)      # (T, E)

    # ---- fused input projection for BOTH directions (single MXU matmul) ----
    xg = jnp.dot(x, win_ref[...], preferred_element_type=jnp.float32) + b_ref[...]  # (T, 8H)

    # Step i consumes the forward lanes of row i and the backward lanes of row
    # T-1-i (the backward direction walks the sequence reversed).  H is a power
    # of two, so "forward gate sub-block" == (lane & H) == 0.
    lane_g = lax.broadcasted_iota(jnp.int32, (T, G), 1)
    dir_mask = jnp.bitwise_and(lane_g, H) == 0
    xg_rev = jnp.concatenate([xg[T - 1 - i:T - i, :] for i in range(T)], axis=0)
    xg_comb = jnp.where(dir_mask, xg, xg_rev)                              # (T, 8H)

    # Hoisted loop invariants.
    whh = whh_ref[...]                                                     # (2H, 8H)
    lane_row = lax.broadcasted_iota(jnp.int32, (1, G), 1)
    g_mask = (lane_row >= 4 * H) & (lane_row < 6 * H)                      # tanh ("g") lanes

    # ---- packed bidirectional LSTM recurrence (fully unrolled) ----
    h = h0_ref[...]                                                        # (1, 2H)
    c = c0_ref[...]
    hs = []
    for i in range(T):
        g = xg_comb[i:i + 1, :] + jnp.dot(h, whh,
                                          preferred_element_type=jnp.float32)  # (1, 8H)
        # Full-width activations (EUP), lane-select between sigmoid and tanh.
        act = jnp.where(g_mask, jnp.tanh(g), jax.nn.sigmoid(g))
        i_g = act[:, 0 * H2:1 * H2]          # 32-lane aligned gate groups
        f_g = act[:, 1 * H2:2 * H2]
        g_g = act[:, 2 * H2:3 * H2]
        o_g = act[:, 3 * H2:4 * H2]
        c = f_g * c + i_g * g_g
        h = o_g * jnp.tanh(c)
        hs.append(h)                         # hs[i] = [h_fwd(t=i) | h_bwd(t=T-1-i)]

    # Un-scramble so row t = [h_fwd(t) | h_bwd(t)]  (single select, no scratch).
    S = jnp.concatenate(hs, axis=0)                                        # (T, 2H)
    Sr = jnp.concatenate(hs[::-1], axis=0)
    lane_h = lax.broadcasted_iota(jnp.int32, (T, H2), 1)
    lstm_out = jnp.where(lane_h < H, S, Sr)

    feats = (jnp.dot(lstm_out, wtag_ref[...], preferred_element_type=jnp.float32)
             + btag_ref[...])                                              # (T, K)

    # ---- CRF Viterbi forward recursion (one cross-lane max per step) ----
    trans = trans_ref[...]                                                 # (K, K)
    lane_k = lax.broadcasted_iota(jnp.int32, (1, K), 1)
    fv = jnp.where(lane_k == start_idx, 0.0, -10000.0).astype(jnp.float32)
    fvs = []
    for t in range(T):
        fvs.append(fv)                       # forward_var entering step t
        M = fv + trans                       # (K, K): prev tags on lanes
        fv = jnp.max(M, axis=1).reshape(1, K) + feats[t:t + 1, :]

    terminal = fv + trans[stop_idx:stop_idx + 1, :]                        # (1, K)
    tmax = jnp.max(terminal, axis=1, keepdims=True)                        # (1, 1) path score
    best = jnp.min(jnp.where(terminal == tmax, lane_k, K),
                   axis=1, keepdims=True).astype(jnp.int32)                # first argmax

    # ---- in-kernel backtrace (vector one-hot form, backpointers re-derived) ----
    t_lane = lax.broadcasted_iota(jnp.int32, (1, T), 1)
    path = jnp.where(t_lane == (T - 1), best, 0)
    onehot = (lane_k == best).astype(jnp.float32)                          # (1, K)
    cur = best
    for t in range(T - 1, -1, -1):
        # Row of transitions for the currently selected "next" tag (exact matvec).
        trans_sel = jnp.dot(onehot, trans, preferred_element_type=jnp.float32)  # (1, K)
        row = fvs[t] + trans_sel
        rmax = jnp.max(row, axis=1, keepdims=True)
        cur = jnp.min(jnp.where(row == rmax, lane_k, K),
                      axis=1, keepdims=True).astype(jnp.int32)             # backpointer
        if t > 0:
            path = jnp.where(t_lane == (t - 1), cur, path)
        onehot = (lane_k == cur).astype(jnp.float32)

    path_ref[...] = path
    score_ref[...] = tmax
    start_ref[...] = cur                     # backpointer at t=0: must be START


# ---------------------------------------------------------------------------
# Host-side weight packing (gate layout [i_f,i_b,f_f,f_b,g_f,g_b,o_f,o_b])
# ---------------------------------------------------------------------------
def _interleave_gate_cols(wf, wb, H):
    blocks = []
    for g in range(4):                       # PyTorch gate order: i, f, g, o
        blocks.append(wf[..., g * H:(g + 1) * H])
        blocks.append(wb[..., g * H:(g + 1) * H])
    return jnp.concatenate(blocks, axis=-1)


def pack_bilstm_params(wih, whh, b, h0, c0):
    # wih: (2, E, 4H), whh: (2, H, 4H), b: (2, 1, 4H), h0/c0: (2, 1, H);  dim0 = [fwd, bwd]
    H = whh.shape[1]
    win_p = _interleave_gate_cols(wih[0], wih[1], H)                       # (E, 8H)
    b_p = _interleave_gate_cols(b[0], b[1], H)                             # (1, 8H)
    whh_f = _interleave_gate_cols(whh[0], jnp.zeros_like(whh[0]), H)       # (H, 8H)
    whh_b = _interleave_gate_cols(jnp.zeros_like(whh[1]), whh[1], H)       # (H, 8H)
    whh_p = jnp.concatenate([whh_f, whh_b], axis=0)                        # (2H, 8H)
    h0_p = jnp.concatenate([h0[0], h0[1]], axis=-1)                        # (1, 2H)
    c0_p = jnp.concatenate([c0[0], c0[1]], axis=-1)
    return win_p, whh_p, b_p, h0_p, c0_p


# ---------------------------------------------------------------------------
# Wrapper
# ---------------------------------------------------------------------------
def lstm_crf_forward(one_hots, emb, win_p, whh_p, b_p, h0_p, c0_p, wtag, btag,
                     trans, start_idx, stop_idx):
    T = one_hots.shape[0]
    K = trans.shape[0]
    H = h0_p.shape[1] // 2
    assert (H & (H - 1)) == 0, "per-direction hidden size must be a power of two"

    vmem = pl.BlockSpec(memory_space=pltpu.MemorySpace.VMEM)
    smem = pl.BlockSpec(memory_space=pltpu.MemorySpace.SMEM)
    path, score, start = pl.pallas_call(
        functools.partial(_fused_forward_kernel,
                          start_idx=start_idx, stop_idx=stop_idx),
        out_shape=(jax.ShapeDtypeStruct((1, T), jnp.int32),
                   jax.ShapeDtypeStruct((1, 1), jnp.float32),
                   jax.ShapeDtypeStruct((1, 1), jnp.int32)),
        in_specs=[smem] + [vmem] * 9,
        out_specs=(vmem, vmem, vmem),
    )(one_hots.astype(jnp.int32), emb, win_p, whh_p, b_p, h0_p, c0_p,
      wtag, btag, trans)
    return score[0, 0], path[0], start[0, 0]


# ---------------------------------------------------------------------------
# Main
# ---------------------------------------------------------------------------
if __name__ == "__main__":
    T = 8            # sequence length
    E = 32           # embed_dim
    RNN_UNITS = 32   # rnn_units -> per-direction hidden H = 16
    V = 50           # vocab size
    H = RNN_UNITS // 2
    tag_to_ix = {"B": 0, "I": 1, "O": 2, START_TAG: 3, STOP_TAG: 4}
    K = len(tag_to_ix)

    key = jax.random.PRNGKey(0)
    ks = jax.random.split(key, 12)

    emb = jax.random.normal(ks[0], (V, E), jnp.float32) * 0.1
    # Per-direction LSTM weights, pre-transposed for x @ W: (2, E, 4H) / (2, H, 4H)
    wih = jax.random.normal(ks[1], (2, E, 4 * H), jnp.float32) * 0.1
    whh = jax.random.normal(ks[2], (2, H, 4 * H), jnp.float32) * 0.1
    b_ih = jax.random.normal(ks[3], (2, 1, 4 * H), jnp.float32) * 0.1
    b_hh = jax.random.normal(ks[4], (2, 1, 4 * H), jnp.float32) * 0.1
    b = b_ih + b_hh
    # init_hidden(): random initial (h0, c0), shape (2 directions, 1, H)
    h0 = jax.random.normal(ks[5], (2, 1, H), jnp.float32)
    c0 = jax.random.normal(ks[6], (2, 1, H), jnp.float32)
    # hidden2tag: Linear(rnn_units, K), pre-transposed to (2H, K)
    wtag = jax.random.normal(ks[7], (RNN_UNITS, K), jnp.float32) * 0.1
    btag = jax.random.normal(ks[8], (1, K), jnp.float32) * 0.1
    # CRF transitions with START/STOP constraints (as in __init__)
    trans = jax.random.normal(ks[9], (K, K), jnp.float32)
    trans = trans.at[tag_to_ix[START_TAG], :].set(-10000.0)
    trans = trans.at[:, tag_to_ix[STOP_TAG]].set(-10000.0)

    one_hots = jax.random.randint(ks[10], (T,), 0, V)
    # lengths are all == T (see TODO(synk) above)

    win_p, whh_p, b_p, h0_p, c0_p = pack_bilstm_params(wih, whh, b, h0, c0)

    score, tag_seq, start_tag = lstm_crf_forward(
        one_hots, emb, win_p, whh_p, b_p, h0_p, c0_p, wtag, btag, trans,
        tag_to_ix[START_TAG], tag_to_ix[STOP_TAG])
    score = jax.block_until_ready(score)
    tag_seq = jax.block_until_ready(tag_seq)
    start_tag = jax.block_until_ready(start_tag)

    assert int(start_tag) == tag_to_ix[START_TAG]
    assert tag_seq.shape == (T,)
    print("KERNEL_OK")
</pallas_src>

<mosaic_0001>
module attributes {stable_mosaic.version = 11 : i64} {
  func.func @_fused_forward_kernel(%arg0: memref<8xi32, #tpu.memory_space<smem>>, %arg1: memref<50x32xf32, #tpu.memory_space<vmem>>, %arg2: memref<32x128xf32, #tpu.memory_space<vmem>>, %arg3: memref<32x128xf32, #tpu.memory_space<vmem>>, %arg4: memref<1x128xf32, #tpu.memory_space<vmem>>, %arg5: memref<1x32xf32, #tpu.memory_space<vmem>>, %arg6: memref<1x32xf32, #tpu.memory_space<vmem>>, %arg7: memref<32x5xf32, #tpu.memory_space<vmem>>, %arg8: memref<1x5xf32, #tpu.memory_space<vmem>>, %arg9: memref<5x5xf32, #tpu.memory_space<vmem>>, %arg10: memref<1x8xi32, #tpu.memory_space<vmem>>, %arg11: memref<1x1xf32, #tpu.memory_space<vmem>>, %arg12: memref<1x1xi32, #tpu.memory_space<vmem>>) attributes {dimension_semantics = [], scalar_prefetch = 0 : i64, scratch_operands = 0 : i64, tpu.core_type = #tpu.core_type<tc>} {
    %c0 = arith.constant 0 : index
    %0 = memref.load %arg0[%c0] : memref<8xi32, #tpu.memory_space<smem>>
    %1 = arith.index_cast %0 : i32 to index
    %c0_0 = arith.constant 0 : index
    %2 = vector.load %arg1[%1, %c0_0] : memref<50x32xf32, #tpu.memory_space<vmem>>, vector<1x32xf32>
    %c1 = arith.constant 1 : index
    %3 = memref.load %arg0[%c1] : memref<8xi32, #tpu.memory_space<smem>>
    %4 = arith.index_cast %3 : i32 to index
    %c0_1 = arith.constant 0 : index
    %5 = vector.load %arg1[%4, %c0_1] : memref<50x32xf32, #tpu.memory_space<vmem>>, vector<1x32xf32>
    %c2 = arith.constant 2 : index
    %6 = memref.load %arg0[%c2] : memref<8xi32, #tpu.memory_space<smem>>
    %7 = arith.index_cast %6 : i32 to index
    %c0_2 = arith.constant 0 : index
    %8 = vector.load %arg1[%7, %c0_2] : memref<50x32xf32, #tpu.memory_space<vmem>>, vector<1x32xf32>
    %c3 = arith.constant 3 : index
    %9 = memref.load %arg0[%c3] : memref<8xi32, #tpu.memory_space<smem>>
    %10 = arith.index_cast %9 : i32 to index
    %c0_3 = arith.constant 0 : index
    %11 = vector.load %arg1[%10, %c0_3] : memref<50x32xf32, #tpu.memory_space<vmem>>, vector<1x32xf32>
    %c4 = arith.constant 4 : index
    %12 = memref.load %arg0[%c4] : memref<8xi32, #tpu.memory_space<smem>>
    %13 = arith.index_cast %12 : i32 to index
    %c0_4 = arith.constant 0 : index
    %14 = vector.load %arg1[%13, %c0_4] : memref<50x32xf32, #tpu.memory_space<vmem>>, vector<1x32xf32>
    %c5 = arith.constant 5 : index
    %15 = memref.load %arg0[%c5] : memref<8xi32, #tpu.memory_space<smem>>
    %16 = arith.index_cast %15 : i32 to index
    %c0_5 = arith.constant 0 : index
    %17 = vector.load %arg1[%16, %c0_5] : memref<50x32xf32, #tpu.memory_space<vmem>>, vector<1x32xf32>
    %c6 = arith.constant 6 : index
    %18 = memref.load %arg0[%c6] : memref<8xi32, #tpu.memory_space<smem>>
    %19 = arith.index_cast %18 : i32 to index
    %c0_6 = arith.constant 0 : index
    %20 = vector.load %arg1[%19, %c0_6] : memref<50x32xf32, #tpu.memory_space<vmem>>, vector<1x32xf32>
    %c7 = arith.constant 7 : index
    %21 = memref.load %arg0[%c7] : memref<8xi32, #tpu.memory_space<smem>>
    %22 = arith.index_cast %21 : i32 to index
    %c0_7 = arith.constant 0 : index
    %23 = vector.load %arg1[%22, %c0_7] : memref<50x32xf32, #tpu.memory_space<vmem>>, vector<1x32xf32>
    %24 = tpu.concatenate %2, %5, %8, %11, %14, %17, %20, %23 in 0 : vector<1x32xf32>, vector<1x32xf32>, vector<1x32xf32>, vector<1x32xf32>, vector<1x32xf32>, vector<1x32xf32>, vector<1x32xf32>, vector<1x32xf32> -> vector<8x32xf32>
    %c0_8 = arith.constant 0 : index
    %c0_9 = arith.constant 0 : index
    %25 = vector.load %arg2[%c0_8, %c0_9] : memref<32x128xf32, #tpu.memory_space<vmem>>, vector<32x128xf32>
    %cst = arith.constant dense<0.000000e+00> : vector<8x128xf32>
    %26 = tpu.matmul %24, %25, %cst {dimension_numbers = #tpu.dot_dimension_numbers<[1], [0], [0], [1], [0, 0, 1, 1], [], []>} : vector<8x32xf32>, vector<32x128xf32>, vector<8x128xf32> -> vector<8x128xf32>
    %c0_10 = arith.constant 0 : index
    %c0_11 = arith.constant 0 : index
    %27 = vector.load %arg4[%c0_10, %c0_11] : memref<1x128xf32, #tpu.memory_space<vmem>>, vector<1x128xf32>
    %28 = vector.broadcast %27 : vector<1x128xf32> to vector<8x128xf32>
    %29 = arith.addf %26, %28 : vector<8x128xf32>
    %30 = tpu.iota {dimensions = array<i32: 1>} : vector<8x128xi32>
    %c16_i32 = arith.constant 16 : i32
    %31 = vector.broadcast %c16_i32 : i32 to vector<8x128xi32>
    %32 = arith.andi %30, %31 : vector<8x128xi32>
    %c0_i32 = arith.constant 0 : i32
    %33 = vector.broadcast %c0_i32 : i32 to vector<8x128xi32>
    %34 = arith.cmpi eq, %32, %33 : vector<8x128xi32>
    %35 = vector.extract_strided_slice %29 {offsets = [7, 0], sizes = [1, 128], strides = [1, 1]} : vector<8x128xf32> to vector<1x128xf32>
    %36 = vector.extract_strided_slice %29 {offsets = [6, 0], sizes = [1, 128], strides = [1, 1]} : vector<8x128xf32> to vector<1x128xf32>
    %37 = vector.extract_strided_slice %29 {offsets = [5, 0], sizes = [1, 128], strides = [1, 1]} : vector<8x128xf32> to vector<1x128xf32>
    %38 = vector.extract_strided_slice %29 {offsets = [4, 0], sizes = [1, 128], strides = [1, 1]} : vector<8x128xf32> to vector<1x128xf32>
    %39 = vector.extract_strided_slice %29 {offsets = [3, 0], sizes = [1, 128], strides = [1, 1]} : vector<8x128xf32> to vector<1x128xf32>
    %40 = vector.extract_strided_slice %29 {offsets = [2, 0], sizes = [1, 128], strides = [1, 1]} : vector<8x128xf32> to vector<1x128xf32>
    %41 = vector.extract_strided_slice %29 {offsets = [1, 0], sizes = [1, 128], strides = [1, 1]} : vector<8x128xf32> to vector<1x128xf32>
    %42 = vector.extract_strided_slice %29 {offsets = [0, 0], sizes = [1, 128], strides = [1, 1]} : vector<8x128xf32> to vector<1x128xf32>
    %43 = tpu.concatenate %35, %36, %37, %38, %39, %40, %41, %42 in 0 : vector<1x128xf32>, vector<1x128xf32>, vector<1x128xf32>, vector<1x128xf32>, vector<1x128xf32>, vector<1x128xf32>, vector<1x128xf32>, vector<1x128xf32> -> vector<8x128xf32>
    %44 = arith.select %34, %29, %43 : vector<8x128xi1>, vector<8x128xf32>
    %c0_12 = arith.constant 0 : index
    %c0_13 = arith.constant 0 : index
    %45 = vector.load %arg3[%c0_12, %c0_13] : memref<32x128xf32, #tpu.memory_space<vmem>>, vector<32x128xf32>
    %46 = tpu.iota {dimensions = array<i32: 1>} : vector<1x128xi32>
    %c64_i32 = arith.constant 64 : i32
    %47 = vector.broadcast %c64_i32 : i32 to vector<1x128xi32>
    %48 = arith.cmpi sge, %46, %47 : vector<1x128xi32>
    %c96_i32 = arith.constant 96 : i32
    %49 = vector.broadcast %c96_i32 : i32 to vector<1x128xi32>
    %50 = arith.cmpi slt, %46, %49 : vector<1x128xi32>
    %51 = arith.andi %48, %50 : vector<1x128xi1>
    %c0_14 = arith.constant 0 : index
    %c0_15 = arith.constant 0 : index
    %52 = vector.load %arg5[%c0_14, %c0_15] : memref<1x32xf32, #tpu.memory_space<vmem>>, vector<1x32xf32>
    %c0_16 = arith.constant 0 : index
    %c0_17 = arith.constant 0 : index
    %53 = vector.load %arg6[%c0_16, %c0_17] : memref<1x32xf32, #tpu.memory_space<vmem>>, vector<1x32xf32>
    %54 = vector.extract_strided_slice %44 {offsets = [0, 0], sizes = [1, 128], strides = [1, 1]} : vector<8x128xf32> to vector<1x128xf32>
    %cst_18 = arith.constant dense<0.000000e+00> : vector<1x128xf32>
    %55 = tpu.matmul %52, %45, %cst_18 {dimension_numbers = #tpu.dot_dimension_numbers<[1], [0], [0], [1], [0, 0, 1, 1], [], []>} : vector<1x32xf32>, vector<32x128xf32>, vector<1x128xf32> -> vector<1x128xf32>
    %56 = arith.addf %54, %55 : vector<1x128xf32>
    %57 = math.tanh %56 : vector<1x128xf32>
    %58 = arith.negf %56 : vector<1x128xf32>
    %59 = math.exp %58 : vector<1x128xf32>
    %cst_19 = arith.constant 1.000000e+00 : f32
    %60 = vector.broadcast %cst_19 : f32 to vector<1x128xf32>
    %61 = arith.addf %60, %59 : vector<1x128xf32>
    %62 = arith.divf %60, %61 : vector<1x128xf32>
    %63 = arith.select %51, %57, %62 : vector<1x128xi1>, vector<1x128xf32>
    %64 = vector.extract_strided_slice %63 {offsets = [0, 0], sizes = [1, 32], strides = [1, 1]} : vector<1x128xf32> to vector<1x32xf32>
    %65 = vector.extract_strided_slice %63 {offsets = [0, 32], sizes = [1, 32], strides = [1, 1]} : vector<1x128xf32> to vector<1x32xf32>
    %66 = vector.extract_strided_slice %63 {offsets = [0, 64], sizes = [1, 32], strides = [1, 1]} : vector<1x128xf32> to vector<1x32xf32>
    %67 = vector.extract_strided_slice %63 {offsets = [0, 96], sizes = [1, 32], strides = [1, 1]} : vector<1x128xf32> to vector<1x32xf32>
    %68 = arith.mulf %65, %53 : vector<1x32xf32>
    %69 = arith.mulf %64, %66 : vector<1x32xf32>
    %70 = arith.addf %68, %69 : vector<1x32xf32>
    %71 = math.tanh %70 : vector<1x32xf32>
    %72 = arith.mulf %67, %71 : vector<1x32xf32>
    %73 = vector.extract_strided_slice %44 {offsets = [1, 0], sizes = [1, 128], strides = [1, 1]} : vector<8x128xf32> to vector<1x128xf32>
    %cst_20 = arith.constant dense<0.000000e+00> : vector<1x128xf32>
    %74 = tpu.matmul %72, %45, %cst_20 {dimension_numbers = #tpu.dot_dimension_numbers<[1], [0], [0], [1], [0, 0, 1, 1], [], []>} : vector<1x32xf32>, vector<32x128xf32>, vector<1x128xf32> -> vector<1x128xf32>
    %75 = arith.addf %73, %74 : vector<1x128xf32>
    %76 = math.tanh %75 : vector<1x128xf32>
    %77 = arith.negf %75 : vector<1x128xf32>
    %78 = math.exp %77 : vector<1x128xf32>
    %cst_21 = arith.constant 1.000000e+00 : f32
    %79 = vector.broadcast %cst_21 : f32 to vector<1x128xf32>
    %80 = arith.addf %79, %78 : vector<1x128xf32>
    %81 = arith.divf %79, %80 : vector<1x128xf32>
    %82 = arith.select %51, %76, %81 : vector<1x128xi1>, vector<1x128xf32>
    %83 = vector.extract_strided_slice %82 {offsets = [0, 0], sizes = [1, 32], strides = [1, 1]} : vector<1x128xf32> to vector<1x32xf32>
    %84 = vector.extract_strided_slice %82 {offsets = [0, 32], sizes = [1, 32], strides = [1, 1]} : vector<1x128xf32> to vector<1x32xf32>
    %85 = vector.extract_strided_slice %82 {offsets = [0, 64], sizes = [1, 32], strides = [1, 1]} : vector<1x128xf32> to vector<1x32xf32>
    %86 = vector.extract_strided_slice %82 {offsets = [0, 96], sizes = [1, 32], strides = [1, 1]} : vector<1x128xf32> to vector<1x32xf32>
    %87 = arith.mulf %84, %70 : vector<1x32xf32>
    %88 = arith.mulf %83, %85 : vector<1x32xf32>
    %89 = arith.addf %87, %88 : vector<1x32xf32>
    %90 = math.tanh %89 : vector<1x32xf32>
    %91 = arith.mulf %86, %90 : vector<1x32xf32>
    %92 = vector.extract_strided_slice %44 {offsets = [2, 0], sizes = [1, 128], strides = [1, 1]} : vector<8x128xf32> to vector<1x128xf32>
    %cst_22 = arith.constant dense<0.000000e+00> : vector<1x128xf32>
    %93 = tpu.matmul %91, %45, %cst_22 {dimension_numbers = #tpu.dot_dimension_numbers<[1], [0], [0], [1], [0, 0, 1, 1], [], []>} : vector<1x32xf32>, vector<32x128xf32>, vector<1x128xf32> -> vector<1x128xf32>
    %94 = arith.addf %92, %93 : vector<1x128xf32>
    %95 = math.tanh %94 : vector<1x128xf32>
    %96 = arith.negf %94 : vector<1x128xf32>
    %97 = math.exp %96 : vector<1x128xf32>
    %cst_23 = arith.constant 1.000000e+00 : f32
    %98 = vector.broadcast %cst_23 : f32 to vector<1x128xf32>
    %99 = arith.addf %98, %97 : vector<1x128xf32>
    %100 = arith.divf %98, %99 : vector<1x128xf32>
    %101 = arith.select %51, %95, %100 : vector<1x128xi1>, vector<1x128xf32>
    %102 = vector.extract_strided_slice %101 {offsets = [0, 0], sizes = [1, 32], strides = [1, 1]} : vector<1x128xf32> to vector<1x32xf32>
    %103 = vector.extract_strided_slice %101 {offsets = [0, 32], sizes = [1, 32], strides = [1, 1]} : vector<1x128xf32> to vector<1x32xf32>
    %104 = vector.extract_strided_slice %101 {offsets = [0, 64], sizes = [1, 32], strides = [1, 1]} : vector<1x128xf32> to vector<1x32xf32>
    %105 = vector.extract_strided_slice %101 {offsets = [0, 96], sizes = [1, 32], strides = [1, 1]} : vector<1x128xf32> to vector<1x32xf32>
    %106 = arith.mulf %103, %89 : vector<1x32xf32>
    %107 = arith.mulf %102, %104 : vector<1x32xf32>
    %108 = arith.addf %106, %107 : vector<1x32xf32>
    %109 = math.tanh %108 : vector<1x32xf32>
    %110 = arith.mulf %105, %109 : vector<1x32xf32>
    %111 = vector.extract_strided_slice %44 {offsets = [3, 0], sizes = [1, 128], strides = [1, 1]} : vector<8x128xf32> to vector<1x128xf32>
    %cst_24 = arith.constant dense<0.000000e+00> : vector<1x128xf32>
    %112 = tpu.matmul %110, %45, %cst_24 {dimension_numbers = #tpu.dot_dimension_numbers<[1], [0], [0], [1], [0, 0, 1, 1], [], []>} : vector<1x32xf32>, vector<32x128xf32>, vector<1x128xf32> -> vector<1x128xf32>
    %113 = arith.addf %111, %112 : vector<1x128xf32>
    %114 = math.tanh %113 : vector<1x128xf32>
    %115 = arith.negf %113 : vector<1x128xf32>
    %116 = math.exp %115 : vector<1x128xf32>
    %cst_25 = arith.constant 1.000000e+00 : f32
    %117 = vector.broadcast %cst_25 : f32 to vector<1x128xf32>
    %118 = arith.addf %117, %116 : vector<1x128xf32>
    %119 = arith.divf %117, %118 : vector<1x128xf32>
    %120 = arith.select %51, %114, %119 : vector<1x128xi1>, vector<1x128xf32>
    %121 = vector.extract_strided_slice %120 {offsets = [0, 0], sizes = [1, 32], strides = [1, 1]} : vector<1x128xf32> to vector<1x32xf32>
    %122 = vector.extract_strided_slice %120 {offsets = [0, 32], sizes = [1, 32], strides = [1, 1]} : vector<1x128xf32> to vector<1x32xf32>
    %123 = vector.extract_strided_slice %120 {offsets = [0, 64], sizes = [1, 32], strides = [1, 1]} : vector<1x128xf32> to vector<1x32xf32>
    %124 = vector.extract_strided_slice %120 {offsets = [0, 96], sizes = [1, 32], strides = [1, 1]} : vector<1x128xf32> to vector<1x32xf32>
    %125 = arith.mulf %122, %108 : vector<1x32xf32>
    %126 = arith.mulf %121, %123 : vector<1x32xf32>
    %127 = arith.addf %125, %126 : vector<1x32xf32>
    %128 = math.tanh %127 : vector<1x32xf32>
    %129 = arith.mulf %124, %128 : vector<1x32xf32>
    %130 = vector.extract_strided_slice %44 {offsets = [4, 0], sizes = [1, 128], strides = [1, 1]} : vector<8x128xf32> to vector<1x128xf32>
    %cst_26 = arith.constant dense<0.000000e+00> : vector<1x128xf32>
    %131 = tpu.matmul %129, %45, %cst_26 {dimension_numbers = #tpu.dot_dimension_numbers<[1], [0], [0], [1], [0, 0, 1, 1], [], []>} : vector<1x32xf32>, vector<32x128xf32>, vector<1x128xf32> -> vector<1x128xf32>
    %132 = arith.addf %130, %131 : vector<1x128xf32>
    %133 = math.tanh %132 : vector<1x128xf32>
    %134 = arith.negf %132 : vector<1x128xf32>
    %135 = math.exp %134 : vector<1x128xf32>
    %cst_27 = arith.constant 1.000000e+00 : f32
    %136 = vector.broadcast %cst_27 : f32 to vector<1x128xf32>
    %137 = arith.addf %136, %135 : vector<1x128xf32>
    %138 = arith.divf %136, %137 : vector<1x128xf32>
    %139 = arith.select %51, %133, %138 : vector<1x128xi1>, vector<1x128xf32>
    %140 = vector.extract_strided_slice %139 {offsets = [0, 0], sizes = [1, 32], strides = [1, 1]} : vector<1x128xf32> to vector<1x32xf32>
    %141 = vector.extract_strided_slice %139 {offsets = [0, 32], sizes = [1, 32], strides = [1, 1]} : vector<1x128xf32> to vector<1x32xf32>
    %142 = vector.extract_strided_slice %139 {offsets = [0, 64], sizes = [1, 32], strides = [1, 1]} : vector<1x128xf32> to vector<1x32xf32>
    %143 = vector.extract_strided_slice %139 {offsets = [0, 96], sizes = [1, 32], strides = [1, 1]} : vector<1x128xf32> to vector<1x32xf32>
    %144 = arith.mulf %141, %127 : vector<1x32xf32>
    %145 = arith.mulf %140, %142 : vector<1x32xf32>
    %146 = arith.addf %144, %145 : vector<1x32xf32>
    %147 = math.tanh %146 : vector<1x32xf32>
    %148 = arith.mulf %143, %147 : vector<1x32xf32>
    %149 = vector.extract_strided_slice %44 {offsets = [5, 0], sizes = [1, 128], strides = [1, 1]} : vector<8x128xf32> to vector<1x128xf32>
    %cst_28 = arith.constant dense<0.000000e+00> : vector<1x128xf32>
    %150 = tpu.matmul %148, %45, %cst_28 {dimension_numbers = #tpu.dot_dimension_numbers<[1], [0], [0], [1], [0, 0, 1, 1], [], []>} : vector<1x32xf32>, vector<32x128xf32>, vector<1x128xf32> -> vector<1x128xf32>
    %151 = arith.addf %149, %150 : vector<1x128xf32>
    %152 = math.tanh %151 : vector<1x128xf32>
    %153 = arith.negf %151 : vector<1x128xf32>
    %154 = math.exp %153 : vector<1x128xf32>
    %cst_29 = arith.constant 1.000000e+00 : f32
    %155 = vector.broadcast %cst_29 : f32 to vector<1x128xf32>
    %156 = arith.addf %155, %154 : vector<1x128xf32>
    %157 = arith.divf %155, %156 : vector<1x128xf32>
    %158 = arith.select %51, %152, %157 : vector<1x128xi1>, vector<1x128xf32>
    %159 = vector.extract_strided_slice %158 {offsets = [0, 0], sizes = [1, 32], strides = [1, 1]} : vector<1x128xf32> to vector<1x32xf32>
    %160 = vector.extract_strided_slice %158 {offsets = [0, 32], sizes = [1, 32], strides = [1, 1]} : vector<1x128xf32> to vector<1x32xf32>
    %161 = vector.extract_strided_slice %158 {offsets = [0, 64], sizes = [1, 32], strides = [1, 1]} : vector<1x128xf32> to vector<1x32xf32>
    %162 = vector.extract_strided_slice %158 {offsets = [0, 96], sizes = [1, 32], strides = [1, 1]} : vector<1x128xf32> to vector<1x32xf32>
    %163 = arith.mulf %160, %146 : vector<1x32xf32>
    %164 = arith.mulf %159, %161 : vector<1x32xf32>
    %165 = arith.addf %163, %164 : vector<1x32xf32>
    %166 = math.tanh %165 : vector<1x32xf32>
    %167 = arith.mulf %162, %166 : vector<1x32xf32>
    %168 = vector.extract_strided_slice %44 {offsets = [6, 0], sizes = [1, 128], strides = [1, 1]} : vector<8x128xf32> to vector<1x128xf32>
    %cst_30 = arith.constant dense<0.000000e+00> : vector<1x128xf32>
    %169 = tpu.matmul %167, %45, %cst_30 {dimension_numbers = #tpu.dot_dimension_numbers<[1], [0], [0], [1], [0, 0, 1, 1], [], []>} : vector<1x32xf32>, vector<32x128xf32>, vector<1x128xf32> -> vector<1x128xf32>
    %170 = arith.addf %168, %169 : vector<1x128xf32>
    %171 = math.tanh %170 : vector<1x128xf32>
    %172 = arith.negf %170 : vector<1x128xf32>
    %173 = math.exp %172 : vector<1x128xf32>
    %cst_31 = arith.constant 1.000000e+00 : f32
    %174 = vector.broadcast %cst_31 : f32 to vector<1x128xf32>
    %175 = arith.addf %174, %173 : vector<1x128xf32>
    %176 = arith.divf %174, %175 : vector<1x128xf32>
    %177 = arith.select %51, %171, %176 : vector<1x128xi1>, vector<1x128xf32>
    %178 = vector.extract_strided_slice %177 {offsets = [0, 0], sizes = [1, 32], strides = [1, 1]} : vector<1x128xf32> to vector<1x32xf32>
    %179 = vector.extract_strided_slice %177 {offsets = [0, 32], sizes = [1, 32], strides = [1, 1]} : vector<1x128xf32> to vector<1x32xf32>
    %180 = vector.extract_strided_slice %177 {offsets = [0, 64], sizes = [1, 32], strides = [1, 1]} : vector<1x128xf32> to vector<1x32xf32>
    %181 = vector.extract_strided_slice %177 {offsets = [0, 96], sizes = [1, 32], strides = [1, 1]} : vector<1x128xf32> to vector<1x32xf32>
    %182 = arith.mulf %179, %165 : vector<1x32xf32>
    %183 = arith.mulf %178, %180 : vector<1x32xf32>
    %184 = arith.addf %182, %183 : vector<1x32xf32>
    %185 = math.tanh %184 : vector<1x32xf32>
    %186 = arith.mulf %181, %185 : vector<1x32xf32>
    %187 = vector.extract_strided_slice %44 {offsets = [7, 0], sizes = [1, 128], strides = [1, 1]} : vector<8x128xf32> to vector<1x128xf32>
    %cst_32 = arith.constant dense<0.000000e+00> : vector<1x128xf32>
    %188 = tpu.matmul %186, %45, %cst_32 {dimension_numbers = #tpu.dot_dimension_numbers<[1], [0], [0], [1], [0, 0, 1, 1], [], []>} : vector<1x32xf32>, vector<32x128xf32>, vector<1x128xf32> -> vector<1x128xf32>
    %189 = arith.addf %187, %188 : vector<1x128xf32>
    %190 = math.tanh %189 : vector<1x128xf32>
    %191 = arith.negf %189 : vector<1x128xf32>
    %192 = math.exp %191 : vector<1x128xf32>
    %cst_33 = arith.constant 1.000000e+00 : f32
    %193 = vector.broadcast %cst_33 : f32 to vector<1x128xf32>
    %194 = arith.addf %193, %192 : vector<1x128xf32>
    %195 = arith.divf %193, %194 : vector<1x128xf32>
    %196 = arith.select %51, %190, %195 : vector<1x128xi1>, vector<1x128xf32>
    %197 = vector.extract_strided_slice %196 {offsets = [0, 0], sizes = [1, 32], strides = [1, 1]} : vector<1x128xf32> to vector<1x32xf32>
    %198 = vector.extract_strided_slice %196 {offsets = [0, 32], sizes = [1, 32], strides = [1, 1]} : vector<1x128xf32> to vector<1x32xf32>
    %199 = vector.extract_strided_slice %196 {offsets = [0, 64], sizes = [1, 32], strides = [1, 1]} : vector<1x128xf32> to vector<1x32xf32>
    %200 = vector.extract_strided_slice %196 {offsets = [0, 96], sizes = [1, 32], strides = [1, 1]} : vector<1x128xf32> to vector<1x32xf32>
    %201 = arith.mulf %198, %184 : vector<1x32xf32>
    %202 = arith.mulf %197, %199 : vector<1x32xf32>
    %203 = arith.addf %201, %202 : vector<1x32xf32>
    %204 = math.tanh %203 : vector<1x32xf32>
    %205 = arith.mulf %200, %204 : vector<1x32xf32>
    %206 = tpu.concatenate %72, %91, %110, %129, %148, %167, %186, %205 in 0 : vector<1x32xf32>, vector<1x32xf32>, vector<1x32xf32>, vector<1x32xf32>, vector<1x32xf32>, vector<1x32xf32>, vector<1x32xf32>, vector<1x32xf32> -> vector<8x32xf32>
    %207 = tpu.concatenate %205, %186, %167, %148, %129, %110, %91, %72 in 0 : vector<1x32xf32>, vector<1x32xf32>, vector<1x32xf32>, vector<1x32xf32>, vector<1x32xf32>, vector<1x32xf32>, vector<1x32xf32>, vector<1x32xf32> -> vector<8x32xf32>
    %208 = tpu.iota {dimensions = array<i32: 1>} : vector<8x32xi32>
    %c16_i32_34 = arith.constant 16 : i32
    %209 = vector.broadcast %c16_i32_34 : i32 to vector<8x32xi32>
    %210 = arith.cmpi slt, %208, %209 : vector<8x32xi32>
    %211 = arith.select %210, %206, %207 : vector<8x32xi1>, vector<8x32xf32>
    %c0_35 = arith.constant 0 : index
    %c0_36 = arith.constant 0 : index
    %212 = vector.load %arg7[%c0_35, %c0_36] : memref<32x5xf32, #tpu.memory_space<vmem>>, vector<32x5xf32>
    %cst_37 = arith.constant dense<0.000000e+00> : vector<8x5xf32>
    %213 = tpu.matmul %211, %212, %cst_37 {dimension_numbers = #tpu.dot_dimension_numbers<[1], [0], [0], [1], [0, 0, 1, 1], [], []>} : vector<8x32xf32>, vector<32x5xf32>, vector<8x5xf32> -> vector<8x5xf32>
    %c0_38 = arith.constant 0 : index
    %c0_39 = arith.constant 0 : index
    %214 = vector.load %arg8[%c0_38, %c0_39] : memref<1x5xf32, #tpu.memory_space<vmem>>, vector<1x5xf32>
    %215 = vector.broadcast %214 : vector<1x5xf32> to vector<8x5xf32>
    %216 = arith.addf %213, %215 : vector<8x5xf32>
    %c0_40 = arith.constant 0 : index
    %c0_41 = arith.constant 0 : index
    %217 = vector.load %arg9[%c0_40, %c0_41] : memref<5x5xf32, #tpu.memory_space<vmem>>, vector<5x5xf32>
    %218 = tpu.iota {dimensions = array<i32: 1>} : vector<1x5xi32>
    %c3_i32 = arith.constant 3 : i32
    %219 = vector.broadcast %c3_i32 : i32 to vector<1x5xi32>
    %220 = arith.cmpi eq, %218, %219 : vector<1x5xi32>
    %cst_42 = arith.constant 0.000000e+00 : f32
    %cst_43 = arith.constant -1.000000e+04 : f32
    %221 = vector.broadcast %cst_42 : f32 to vector<1x5xf32>
    %222 = vector.broadcast %cst_43 : f32 to vector<1x5xf32>
    %223 = arith.select %220, %221, %222 : vector<1x5xi1>, vector<1x5xf32>
    %224 = vector.broadcast %223 : vector<1x5xf32> to vector<5x5xf32>
    %225 = arith.addf %224, %217 : vector<5x5xf32>
    %cst_44 = arith.constant dense<0xFF800000> : vector<5xf32>
    %226 = vector.multi_reduction <maximumf>, %225, %cst_44 [1] : vector<5x5xf32> to vector<5xf32>
    %227 = vector.shape_cast %226 : vector<5xf32> to vector<1x5xf32>
    %228 = vector.extract_strided_slice %216 {offsets = [0, 0], sizes = [1, 5], strides = [1, 1]} : vector<8x5xf32> to vector<1x5xf32>
    %229 = arith.addf %227, %228 : vector<1x5xf32>
    %230 = vector.broadcast %229 : vector<1x5xf32> to vector<5x5xf32>
    %231 = arith.addf %230, %217 : vector<5x5xf32>
    %cst_45 = arith.constant dense<0xFF800000> : vector<5xf32>
    %232 = vector.multi_reduction <maximumf>, %231, %cst_45 [1] : vector<5x5xf32> to vector<5xf32>
    %233 = vector.shape_cast %232 : vector<5xf32> to vector<1x5xf32>
    %234 = vector.extract_strided_slice %216 {offsets = [1, 0], sizes = [1, 5], strides = [1, 1]} : vector<8x5xf32> to vector<1x5xf32>
    %235 = arith.addf %233, %234 : vector<1x5xf32>
    %236 = vector.broadcast %235 : vector<1x5xf32> to vector<5x5xf32>
    %237 = arith.addf %236, %217 : vector<5x5xf32>
    %cst_46 = arith.constant dense<0xFF800000> : vector<5xf32>
    %238 = vector.multi_reduction <maximumf>, %237, %cst_46 [1] : vector<5x5xf32> to vector<5xf32>
    %239 = vector.shape_cast %238 : vector<5xf32> to vector<1x5xf32>
    %240 = vector.extract_strided_slice %216 {offsets = [2, 0], sizes = [1, 5], strides = [1, 1]} : vector<8x5xf32> to vector<1x5xf32>
    %241 = arith.addf %239, %240 : vector<1x5xf32>
    %242 = vector.broadcast %241 : vector<1x5xf32> to vector<5x5xf32>
    %243 = arith.addf %242, %217 : vector<5x5xf32>
    %cst_47 = arith.constant dense<0xFF800000> : vector<5xf32>
    %244 = vector.multi_reduction <maximumf>, %243, %cst_47 [1] : vector<5x5xf32> to vector<5xf32>
    %245 = vector.shape_cast %244 : vector<5xf32> to vector<1x5xf32>
    %246 = vector.extract_strided_slice %216 {offsets = [3, 0], sizes = [1, 5], strides = [1, 1]} : vector<8x5xf32> to vector<1x5xf32>
    %247 = arith.addf %245, %246 : vector<1x5xf32>
    %248 = vector.broadcast %247 : vector<1x5xf32> to vector<5x5xf32>
    %249 = arith.addf %248, %217 : vector<5x5xf32>
    %cst_48 = arith.constant dense<0xFF800000> : vector<5xf32>
    %250 = vector.multi_reduction <maximumf>, %249, %cst_48 [1] : vector<5x5xf32> to vector<5xf32>
    %251 = vector.shape_cast %250 : vector<5xf32> to vector<1x5xf32>
    %252 = vector.extract_strided_slice %216 {offsets = [4, 0], sizes = [1, 5], strides = [1, 1]} : vector<8x5xf32> to vector<1x5xf32>
    %253 = arith.addf %251, %252 : vector<1x5xf32>
    %254 = vector.broadcast %253 : vector<1x5xf32> to vector<5x5xf32>
    %255 = arith.addf %254, %217 : vector<5x5xf32>
    %cst_49 = arith.constant dense<0xFF800000> : vector<5xf32>
    %256 = vector.multi_reduction <maximumf>, %255, %cst_49 [1] : vector<5x5xf32> to vector<5xf32>
    %257 = vector.shape_cast %256 : vector<5xf32> to vector<1x5xf32>
    %258 = vector.extract_strided_slice %216 {offsets = [5, 0], sizes = [1, 5], strides = [1, 1]} : vector<8x5xf32> to vector<1x5xf32>
    %259 = arith.addf %257, %258 : vector<1x5xf32>
    %260 = vector.broadcast %259 : vector<1x5xf32> to vector<5x5xf32>
    %261 = arith.addf %260, %217 : vector<5x5xf32>
    %cst_50 = arith.constant dense<0xFF800000> : vector<5xf32>
    %262 = vector.multi_reduction <maximumf>, %261, %cst_50 [1] : vector<5x5xf32> to vector<5xf32>
    %263 = vector.shape_cast %262 : vector<5xf32> to vector<1x5xf32>
    %264 = vector.extract_strided_slice %216 {offsets = [6, 0], sizes = [1, 5], strides = [1, 1]} : vector<8x5xf32> to vector<1x5xf32>
    %265 = arith.addf %263, %264 : vector<1x5xf32>
    %266 = vector.broadcast %265 : vector<1x5xf32> to vector<5x5xf32>
    %267 = arith.addf %266, %217 : vector<5x5xf32>
    %cst_51 = arith.constant dense<0xFF800000> : vector<5xf32>
    %268 = vector.multi_reduction <maximumf>, %267, %cst_51 [1] : vector<5x5xf32> to vector<5xf32>
    %269 = vector.shape_cast %268 : vector<5xf32> to vector<1x5xf32>
    %270 = vector.extract_strided_slice %216 {offsets = [7, 0], sizes = [1, 5], strides = [1, 1]} : vector<8x5xf32> to vector<1x5xf32>
    %271 = arith.addf %269, %270 : vector<1x5xf32>
    %272 = vector.extract_strided_slice %217 {offsets = [4, 0], sizes = [1, 5], strides = [1, 1]} : vector<5x5xf32> to vector<1x5xf32>
    %273 = arith.addf %271, %272 : vector<1x5xf32>
    %cst_52 = arith.constant dense<0xFF800000> : vector<1xf32>
    %274 = vector.multi_reduction <maximumf>, %273, %cst_52 [1] : vector<1x5xf32> to vector<1xf32>
    %275 = vector.shape_cast %274 : vector<1xf32> to vector<1x1xf32>
    %276 = vector.broadcast %275 : vector<1x1xf32> to vector<1x5xf32>
    %277 = arith.cmpf oeq, %273, %276 : vector<1x5xf32>
    %c5_i32 = arith.constant 5 : i32
    %278 = vector.broadcast %c5_i32 : i32 to vector<1x5xi32>
    %279 = arith.select %277, %218, %278 : vector<1x5xi1>, vector<1x5xi32>
    %cst_53 = arith.constant dense<2147483647> : vector<1xi32>
    %280 = vector.multi_reduction <minsi>, %279, %cst_53 [1] : vector<1x5xi32> to vector<1xi32>
    %281 = vector.shape_cast %280 : vector<1xi32> to vector<1x1xi32>
    %282 = tpu.iota {dimensions = array<i32: 1>} : vector<1x8xi32>
    %c7_i32 = arith.constant 7 : i32
    %283 = vector.broadcast %c7_i32 : i32 to vector<1x8xi32>
    %284 = arith.cmpi eq, %282, %283 : vector<1x8xi32>
    %c0_i32_54 = arith.constant 0 : i32
    %285 = vector.shape_cast %281 : vector<1x1xi32> to vector<1x1xi32>
    %286 = vector.broadcast %285 : vector<1x1xi32> to vector<1x8xi32>
    %287 = vector.broadcast %c0_i32_54 : i32 to vector<1x8xi32>
    %288 = arith.select %284, %286, %287 : vector<1x8xi1>, vector<1x8xi32>
    %289 = vector.broadcast %281 : vector<1x1xi32> to vector<1x5xi32>
    %290 = arith.cmpi eq, %218, %289 : vector<1x5xi32>
    %291 = arith.extui %290 : vector<1x5xi1> to vector<1x5xi32>
    %292 = arith.sitofp %291 : vector<1x5xi32> to vector<1x5xf32>
    %cst_55 = arith.constant dense<0.000000e+00> : vector<1x5xf32>
    %293 = tpu.matmul %292, %217, %cst_55 {dimension_numbers = #tpu.dot_dimension_numbers<[1], [0], [0], [1], [0, 0, 1, 1], [], []>} : vector<1x5xf32>, vector<5x5xf32>, vector<1x5xf32> -> vector<1x5xf32>
    %294 = arith.addf %265, %293 : vector<1x5xf32>
    %cst_56 = arith.constant dense<0xFF800000> : vector<1xf32>
    %295 = vector.multi_reduction <maximumf>, %294, %cst_56 [1] : vector<1x5xf32> to vector<1xf32>
    %296 = vector.shape_cast %295 : vector<1xf32> to vector<1x1xf32>
    %297 = vector.broadcast %296 : vector<1x1xf32> to vector<1x5xf32>
    %298 = arith.cmpf oeq, %294, %297 : vector<1x5xf32>
    %c5_i32_57 = arith.constant 5 : i32
    %299 = vector.broadcast %c5_i32_57 : i32 to vector<1x5xi32>
    %300 = arith.select %298, %218, %299 : vector<1x5xi1>, vector<1x5xi32>
    %cst_58 = arith.constant dense<2147483647> : vector<1xi32>
    %301 = vector.multi_reduction <minsi>, %300, %cst_58 [1] : vector<1x5xi32> to vector<1xi32>
    %302 = vector.shape_cast %301 : vector<1xi32> to vector<1x1xi32>
    %c6_i32 = arith.constant 6 : i32
    %303 = vector.broadcast %c6_i32 : i32 to vector<1x8xi32>
    %304 = arith.cmpi eq, %282, %303 : vector<1x8xi32>
    %305 = vector.shape_cast %302 : vector<1x1xi32> to vector<1x1xi32>
    %306 = vector.broadcast %305 : vector<1x1xi32> to vector<1x8xi32>
    %307 = arith.select %304, %306, %288 : vector<1x8xi1>, vector<1x8xi32>
    %308 = vector.broadcast %302 : vector<1x1xi32> to vector<1x5xi32>
    %309 = arith.cmpi eq, %218, %308 : vector<1x5xi32>
    %310 = arith.extui %309 : vector<1x5xi1> to vector<1x5xi32>
    %311 = arith.sitofp %310 : vector<1x5xi32> to vector<1x5xf32>
    %cst_59 = arith.constant dense<0.000000e+00> : vector<1x5xf32>
    %312 = tpu.matmul %311, %217, %cst_59 {dimension_numbers = #tpu.dot_dimension_numbers<[1], [0], [0], [1], [0, 0, 1, 1], [], []>} : vector<1x5xf32>, vector<5x5xf32>, vector<1x5xf32> -> vector<1x5xf32>
    %313 = arith.addf %259, %312 : vector<1x5xf32>
    %cst_60 = arith.constant dense<0xFF800000> : vector<1xf32>
    %314 = vector.multi_reduction <maximumf>, %313, %cst_60 [1] : vector<1x5xf32> to vector<1xf32>
    %315 = vector.shape_cast %314 : vector<1xf32> to vector<1x1xf32>
    %316 = vector.broadcast %315 : vector<1x1xf32> to vector<1x5xf32>
    %317 = arith.cmpf oeq, %313, %316 : vector<1x5xf32>
    %c5_i32_61 = arith.constant 5 : i32
    %318 = vector.broadcast %c5_i32_61 : i32 to vector<1x5xi32>
    %319 = arith.select %317, %218, %318 : vector<1x5xi1>, vector<1x5xi32>
    %cst_62 = arith.constant dense<2147483647> : vector<1xi32>
    %320 = vector.multi_reduction <minsi>, %319, %cst_62 [1] : vector<1x5xi32> to vector<1xi32>
    %321 = vector.shape_cast %320 : vector<1xi32> to vector<1x1xi32>
    %c5_i32_63 = arith.constant 5 : i32
    %322 = vector.broadcast %c5_i32_63 : i32 to vector<1x8xi32>
    %323 = arith.cmpi eq, %282, %322 : vector<1x8xi32>
    %324 = vector.shape_cast %321 : vector<1x1xi32> to vector<1x1xi32>
    %325 = vector.broadcast %324 : vector<1x1xi32> to vector<1x8xi32>
    %326 = arith.select %323, %325, %307 : vector<1x8xi1>, vector<1x8xi32>
    %327 = vector.broadcast %321 : vector<1x1xi32> to vector<1x5xi32>
    %328 = arith.cmpi eq, %218, %327 : vector<1x5xi32>
    %329 = arith.extui %328 : vector<1x5xi1> to vector<1x5xi32>
    %330 = arith.sitofp %329 : vector<1x5xi32> to vector<1x5xf32>
    %cst_64 = arith.constant dense<0.000000e+00> : vector<1x5xf32>
    %331 = tpu.matmul %330, %217, %cst_64 {dimension_numbers = #tpu.dot_dimension_numbers<[1], [0], [0], [1], [0, 0, 1, 1], [], []>} : vector<1x5xf32>, vector<5x5xf32>, vector<1x5xf32> -> vector<1x5xf32>
    %332 = arith.addf %253, %331 : vector<1x5xf32>
    %cst_65 = arith.constant dense<0xFF800000> : vector<1xf32>
    %333 = vector.multi_reduction <maximumf>, %332, %cst_65 [1] : vector<1x5xf32> to vector<1xf32>
    %334 = vector.shape_cast %333 : vector<1xf32> to vector<1x1xf32>
    %335 = vector.broadcast %334 : vector<1x1xf32> to vector<1x5xf32>
    %336 = arith.cmpf oeq, %332, %335 : vector<1x5xf32>
    %c5_i32_66 = arith.constant 5 : i32
    %337 = vector.broadcast %c5_i32_66 : i32 to vector<1x5xi32>
    %338 = arith.select %336, %218, %337 : vector<1x5xi1>, vector<1x5xi32>
    %cst_67 = arith.constant dense<2147483647> : vector<1xi32>
    %339 = vector.multi_reduction <minsi>, %338, %cst_67 [1] : vector<1x5xi32> to vector<1xi32>
    %340 = vector.shape_cast %339 : vector<1xi32> to vector<1x1xi32>
    %c4_i32 = arith.constant 4 : i32
    %341 = vector.broadcast %c4_i32 : i32 to vector<1x8xi32>
    %342 = arith.cmpi eq, %282, %341 : vector<1x8xi32>
    %343 = vector.shape_cast %340 : vector<1x1xi32> to vector<1x1xi32>
    %344 = vector.broadcast %343 : vector<1x1xi32> to vector<1x8xi32>
    %345 = arith.select %342, %344, %326 : vector<1x8xi1>, vector<1x8xi32>
    %346 = vector.broadcast %340 : vector<1x1xi32> to vector<1x5xi32>
    %347 = arith.cmpi eq, %218, %346 : vector<1x5xi32>
    %348 = arith.extui %347 : vector<1x5xi1> to vector<1x5xi32>
    %349 = arith.sitofp %348 : vector<1x5xi32> to vector<1x5xf32>
    %cst_68 = arith.constant dense<0.000000e+00> : vector<1x5xf32>
    %350 = tpu.matmul %349, %217, %cst_68 {dimension_numbers = #tpu.dot_dimension_numbers<[1], [0], [0], [1], [0, 0, 1, 1], [], []>} : vector<1x5xf32>, vector<5x5xf32>, vector<1x5xf32> -> vector<1x5xf32>
    %351 = arith.addf %247, %350 : vector<1x5xf32>
    %cst_69 = arith.constant dense<0xFF800000> : vector<1xf32>
    %352 = vector.multi_reduction <maximumf>, %351, %cst_69 [1] : vector<1x5xf32> to vector<1xf32>
    %353 = vector.shape_cast %352 : vector<1xf32> to vector<1x1xf32>
    %354 = vector.broadcast %353 : vector<1x1xf32> to vector<1x5xf32>
    %355 = arith.cmpf oeq, %351, %354 : vector<1x5xf32>
    %c5_i32_70 = arith.constant 5 : i32
    %356 = vector.broadcast %c5_i32_70 : i32 to vector<1x5xi32>
    %357 = arith.select %355, %218, %356 : vector<1x5xi1>, vector<1x5xi32>
    %cst_71 = arith.constant dense<2147483647> : vector<1xi32>
    %358 = vector.multi_reduction <minsi>, %357, %cst_71 [1] : vector<1x5xi32> to vector<1xi32>
    %359 = vector.shape_cast %358 : vector<1xi32> to vector<1x1xi32>
    %c3_i32_72 = arith.constant 3 : i32
    %360 = vector.broadcast %c3_i32_72 : i32 to vector<1x8xi32>
    %361 = arith.cmpi eq, %282, %360 : vector<1x8xi32>
    %362 = vector.shape_cast %359 : vector<1x1xi32> to vector<1x1xi32>
    %363 = vector.broadcast %362 : vector<1x1xi32> to vector<1x8xi32>
    %364 = arith.select %361, %363, %345 : vector<1x8xi1>, vector<1x8xi32>
    %365 = vector.broadcast %359 : vector<1x1xi32> to vector<1x5xi32>
    %366 = arith.cmpi eq, %218, %365 : vector<1x5xi32>
    %367 = arith.extui %366 : vector<1x5xi1> to vector<1x5xi32>
    %368 = arith.sitofp %367 : vector<1x5xi32> to vector<1x5xf32>
    %cst_73 = arith.constant dense<0.000000e+00> : vector<1x5xf32>
    %369 = tpu.matmul %368, %217, %cst_73 {dimension_numbers = #tpu.dot_dimension_numbers<[1], [0], [0], [1], [0, 0, 1, 1], [], []>} : vector<1x5xf32>, vector<5x5xf32>, vector<1x5xf32> -> vector<1x5xf32>
    %370 = arith.addf %241, %369 : vector<1x5xf32>
    %cst_74 = arith.constant dense<0xFF800000> : vector<1xf32>
    %371 = vector.multi_reduction <maximumf>, %370, %cst_74 [1] : vector<1x5xf32> to vector<1xf32>
    %372 = vector.shape_cast %371 : vector<1xf32> to vector<1x1xf32>
    %373 = vector.broadcast %372 : vector<1x1xf32> to vector<1x5xf32>
    %374 = arith.cmpf oeq, %370, %373 : vector<1x5xf32>
    %c5_i32_75 = arith.constant 5 : i32
    %375 = vector.broadcast %c5_i32_75 : i32 to vector<1x5xi32>
    %376 = arith.select %374, %218, %375 : vector<1x5xi1>, vector<1x5xi32>
    %cst_76 = arith.constant dense<2147483647> : vector<1xi32>
    %377 = vector.multi_reduction <minsi>, %376, %cst_76 [1] : vector<1x5xi32> to vector<1xi32>
    %378 = vector.shape_cast %377 : vector<1xi32> to vector<1x1xi32>
    %c2_i32 = arith.constant 2 : i32
    %379 = vector.broadcast %c2_i32 : i32 to vector<1x8xi32>
    %380 = arith.cmpi eq, %282, %379 : vector<1x8xi32>
    %381 = vector.shape_cast %378 : vector<1x1xi32> to vector<1x1xi32>
    %382 = vector.broadcast %381 : vector<1x1xi32> to vector<1x8xi32>
    %383 = arith.select %380, %382, %364 : vector<1x8xi1>, vector<1x8xi32>
    %384 = vector.broadcast %378 : vector<1x1xi32> to vector<1x5xi32>
    %385 = arith.cmpi eq, %218, %384 : vector<1x5xi32>
    %386 = arith.extui %385 : vector<1x5xi1> to vector<1x5xi32>
    %387 = arith.sitofp %386 : vector<1x5xi32> to vector<1x5xf32>
    %cst_77 = arith.constant dense<0.000000e+00> : vector<1x5xf32>
    %388 = tpu.matmul %387, %217, %cst_77 {dimension_numbers = #tpu.dot_dimension_numbers<[1], [0], [0], [1], [0, 0, 1, 1], [], []>} : vector<1x5xf32>, vector<5x5xf32>, vector<1x5xf32> -> vector<1x5xf32>
    %389 = arith.addf %235, %388 : vector<1x5xf32>
    %cst_78 = arith.constant dense<0xFF800000> : vector<1xf32>
    %390 = vector.multi_reduction <maximumf>, %389, %cst_78 [1] : vector<1x5xf32> to vector<1xf32>
    %391 = vector.shape_cast %390 : vector<1xf32> to vector<1x1xf32>
    %392 = vector.broadcast %391 : vector<1x1xf32> to vector<1x5xf32>
    %393 = arith.cmpf oeq, %389, %392 : vector<1x5xf32>
    %c5_i32_79 = arith.constant 5 : i32
    %394 = vector.broadcast %c5_i32_79 : i32 to vector<1x5xi32>
    %395 = arith.select %393, %218, %394 : vector<1x5xi1>, vector<1x5xi32>
    %cst_80 = arith.constant dense<2147483647> : vector<1xi32>
    %396 = vector.multi_reduction <minsi>, %395, %cst_80 [1] : vector<1x5xi32> to vector<1xi32>
    %397 = vector.shape_cast %396 : vector<1xi32> to vector<1x1xi32>
    %c1_i32 = arith.constant 1 : i32
    %398 = vector.broadcast %c1_i32 : i32 to vector<1x8xi32>
    %399 = arith.cmpi eq, %282, %398 : vector<1x8xi32>
    %400 = vector.shape_cast %397 : vector<1x1xi32> to vector<1x1xi32>
    %401 = vector.broadcast %400 : vector<1x1xi32> to vector<1x8xi32>
    %402 = arith.select %399, %401, %383 : vector<1x8xi1>, vector<1x8xi32>
    %403 = vector.broadcast %397 : vector<1x1xi32> to vector<1x5xi32>
    %404 = arith.cmpi eq, %218, %403 : vector<1x5xi32>
    %405 = arith.extui %404 : vector<1x5xi1> to vector<1x5xi32>
    %406 = arith.sitofp %405 : vector<1x5xi32> to vector<1x5xf32>
    %cst_81 = arith.constant dense<0.000000e+00> : vector<1x5xf32>
    %407 = tpu.matmul %406, %217, %cst_81 {dimension_numbers = #tpu.dot_dimension_numbers<[1], [0], [0], [1], [0, 0, 1, 1], [], []>} : vector<1x5xf32>, vector<5x5xf32>, vector<1x5xf32> -> vector<1x5xf32>
    %408 = arith.addf %229, %407 : vector<1x5xf32>
    %cst_82 = arith.constant dense<0xFF800000> : vector<1xf32>
    %409 = vector.multi_reduction <maximumf>, %408, %cst_82 [1] : vector<1x5xf32> to vector<1xf32>
    %410 = vector.shape_cast %409 : vector<1xf32> to vector<1x1xf32>
    %411 = vector.broadcast %410 : vector<1x1xf32> to vector<1x5xf32>
    %412 = arith.cmpf oeq, %408, %411 : vector<1x5xf32>
    %c5_i32_83 = arith.constant 5 : i32
    %413 = vector.broadcast %c5_i32_83 : i32 to vector<1x5xi32>
    %414 = arith.select %412, %218, %413 : vector<1x5xi1>, vector<1x5xi32>
    %cst_84 = arith.constant dense<2147483647> : vector<1xi32>
    %415 = vector.multi_reduction <minsi>, %414, %cst_84 [1] : vector<1x5xi32> to vector<1xi32>
    %416 = vector.shape_cast %415 : vector<1xi32> to vector<1x1xi32>
    %c0_i32_85 = arith.constant 0 : i32
    %417 = vector.broadcast %c0_i32_85 : i32 to vector<1x8xi32>
    %418 = arith.cmpi eq, %282, %417 : vector<1x8xi32>
    %419 = vector.shape_cast %416 : vector<1x1xi32> to vector<1x1xi32>
    %420 = vector.broadcast %419 : vector<1x1xi32> to vector<1x8xi32>
    %421 = arith.select %418, %420, %402 : vector<1x8xi1>, vector<1x8xi32>
    %422 = vector.broadcast %416 : vector<1x1xi32> to vector<1x5xi32>
    %423 = arith.cmpi eq, %218, %422 : vector<1x5xi32>
    %424 = arith.extui %423 : vector<1x5xi1> to vector<1x5xi32>
    %425 = arith.sitofp %424 : vector<1x5xi32> to vector<1x5xf32>
    %cst_86 = arith.constant dense<0.000000e+00> : vector<1x5xf32>
    %426 = tpu.matmul %425, %217, %cst_86 {dimension_numbers = #tpu.dot_dimension_numbers<[1], [0], [0], [1], [0, 0, 1, 1], [], []>} : vector<1x5xf32>, vector<5x5xf32>, vector<1x5xf32> -> vector<1x5xf32>
    %427 = arith.addf %223, %426 : vector<1x5xf32>
    %cst_87 = arith.constant dense<0xFF800000> : vector<1xf32>
    %428 = vector.multi_reduction <maximumf>, %427, %cst_87 [1] : vector<1x5xf32> to vector<1xf32>
    %429 = vector.shape_cast %428 : vector<1xf32> to vector<1x1xf32>
    %430 = vector.broadcast %429 : vector<1x1xf32> to vector<1x5xf32>
    %431 = arith.cmpf oeq, %427, %430 : vector<1x5xf32>
    %c5_i32_88 = arith.constant 5 : i32
    %432 = vector.broadcast %c5_i32_88 : i32 to vector<1x5xi32>
    %433 = arith.select %431, %218, %432 : vector<1x5xi1>, vector<1x5xi32>
    %cst_89 = arith.constant dense<2147483647> : vector<1xi32>
    %434 = vector.multi_reduction <minsi>, %433, %cst_89 [1] : vector<1x5xi32> to vector<1xi32>
    %435 = vector.shape_cast %434 : vector<1xi32> to vector<1x1xi32>
    %c0_90 = arith.constant 0 : index
    %c0_91 = arith.constant 0 : index
    %436 = vector.load %arg10[%c0_90, %c0_91] : memref<1x8xi32, #tpu.memory_space<vmem>>, vector<1x8xi32>
    tpu.vector_store %arg10[%c0_90, %c0_91], %421 {strides = array<i32>} : memref<1x8xi32, #tpu.memory_space<vmem>>, vector<1x8xi32>,
    %c0_92 = arith.constant 0 : index
    %c0_93 = arith.constant 0 : index
    %437 = vector.load %arg11[%c0_92, %c0_93] : memref<1x1xf32, #tpu.memory_space<vmem>>, vector<1x1xf32>
    tpu.vector_store %arg11[%c0_92, %c0_93], %275 {strides = array<i32>} : memref<1x1xf32, #tpu.memory_space<vmem>>, vector<1x1xf32>,
    %c0_94 = arith.constant 0 : index
    %c0_95 = arith.constant 0 : index
    %438 = vector.load %arg12[%c0_94, %c0_95] : memref<1x1xi32, #tpu.memory_space<vmem>>, vector<1x1xi32>
    tpu.vector_store %arg12[%c0_94, %c0_95], %435 {strides = array<i32>} : memref<1x1xi32, #tpu.memory_space<vmem>>, vector<1x1xi32>,
    return
  }
}

</mosaic_0001>

<bundles_post_ra>
// kernel: tpu_custom_call.1
= control target key start
LH: loop header
LB: loop body
LE: loop exit
PB: predicated region body
PF: predicated region fallthrough
CT: control target
= control target key end

     0   :  { %18 = vsyncpa [#allocation4], 0  ;;  %s2717_s0 = inlined_call_operand.vmem [shape: s32[8], index: 0, kind: input, shape index: {}]   ;;  %s2718_s1 = inlined_call_operand.vmem [shape: f32[50,32], index: 1, kind: input, shape index: {}]   ;;  %s2719_s2 = inlined_call_operand.vmem [shape: f32[32,128], index: 2, kind: input, shape index: {}]   ;;  %s2720_s3 = inlined_call_operand.vmem [shape: f32[32,128], index: 3, kind: input, shape index: {}]   ;;  %s2721_s4 = inlined_call_operand.vmem [shape: f32[1,128], index: 4, kind: input, shape index: {}]   ;;  %s2722_s5 = inlined_call_operand.vmem [shape: f32[1,32], index: 5, kind: input, shape index: {}]   ;;  %s2723_s6 = inlined_call_operand.vmem [shape: f32[1,32], index: 6, kind: input, shape index: {}]   ;;  %s2724_s7 = inlined_call_operand.vmem [shape: f32[32,5], index: 7, kind: input, shape index: {}]   ;;  %s2725_s8 = inlined_call_operand.vmem [shape: f32[1,5], index: 8, kind: input, shape index: {}]   ;;  %s2726_s9 = inlined_call_operand.vmem [shape: f32[5,5], index: 9, kind: input, shape index: {}]   ;;  %s2727_s10 = inlined_call_operand.hbm [shape: s32[1,8], index: 10, kind: output, shape index: {0}]   ;;  %s2728_s11 = inlined_call_operand.hbm [shape: f32[1,1], index: 11, kind: output, shape index: {1}]   ;;  %s2729_s12 = inlined_call_operand.hbm [shape: s32[1,1], index: 12, kind: output, shape index: {2}]  }
   0x1   :  { %19 = vsyncpa [#allocation3], 0 }
   0x2   :  { %20 = vsyncpa [#allocation7], 0  ;;  %s26_s23 = sshll.u32 %s2717_s0, 4  ;;  %s2045_s24 = smov [#allocation2]   ;;  %s27_s23 = int_to_ptr.vmem [resolvable:$true] %s26_s23 }
   0x3   :  { %29 = dma.vmem_to_smem %s27_s23, 16, %s2045_s24, [#allocation4]  }
   0x4   :  { %2039 = dma.done.wait [#allocation4], 16  }
   0x5   :  { %2040 = vsyncadd [#allocation4], 4294967280 }
   0x6   :  { %52 = sfence }
   0x7   :  { %v115_v0 = vld [vmem:[%s2719_s2 + $0x18] sm:$0xff]  ;;  %v114_v1 = vld [vmem:[%s2719_s2 + $0x10] sm:$0xff]  ;;  %s53_s29 = sld [smem:[#allocation2]]  ;;  %v113_v2 = vld [vmem:[%s2719_s2 + $0x8] sm:$0xff]  ;;  %vm98_vm0 = vcmask 1040384   ;;  %vm100_vm1 = vcmask 1041408   ;;  %v144_v32 = vlaneseq }
   0x8   :  { %136 = vmatpush.msra.mxu0 %v115_v0  ;;  %s1804_s30 = sld [smem:[#allocation2 + $0x1]]  ;;  %v2138_v3 = vld [vmem:[%s2720_s3 + $0x18] sm:$0xff]  ;;  %v2143_v4 = vld [vmem:[%s2720_s3 + $0x10] sm:$0xff]  ;;  %v112_v5 = vld [vmem:[%s2719_s2] sm:$0xff]  ;;  %vm102_vm2 = vcmask 1042432   ;;  %vm120_vm3 = vcmask 261120  }
   0x9   :  { %s2131_s0 = sld [smem:[#allocation2 + $0x2]]  ;;  %189 = vmatpush.msra.mxu1 %v2138_v3  ;;  %258 = vmatpush.msra.mxu2 %v2138_v3  ;;  %v2157_v6 = vld [vmem:[%s2720_s3 + $0x8] sm:$0xff]  ;;  %v2175_v7 = vld [vmem:[%s2720_s3] sm:$0xff]  ;;  %vm104_vm4 = vcmask 1043456   ;;  %vm106_vm5 = vcmask 1044480   ;;  %vm108_vm6 = vcmask 1045504  }
   0xa   :  { %137 = vmatpush.msra.mxu0 %v114_v1  ;;  %s2133_s15 = sld [smem:[#allocation2 + $0x3]]  ;;  %329 = vmatpush.msra.mxu3 %v2138_v3  ;;  %v172_v10 = vld [vmem:[%s2722_s5] sm:$0x1]  ;;  %vm110_vm7 = vcmask 1046528   ;;  %v2244_v35 = vand.u32 127, %v144_v32  ;;  %s2047_s20 = smov 32  }
   0xb   :  { %s2148_s22 = sld [smem:[#allocation2 + $0x4]]  ;;  %190 = vmatpush.msra.mxu1 %v2143_v4  ;;  %259 = vmatpush.msra.mxu2 %v2143_v4  ;;  %v1888_v31 = vld [vmem:[%s2721_s4] ss:$0 sm:$0xff]  ;;  %s2046_s4 = smov 64  }
   0xc   :  { %138 = vmatpush.msra.mxu0 %v113_v2  ;;  %s2152_s23 = sld [smem:[#allocation2 + $0x5]]  ;;  %330 = vmatpush.msra.mxu3 %v2143_v4  ;;  %v146_v39 = vand.u32 16, %v2244_v35  ;;  %vm169_vm9 = vcmp.ge.s32.totalorder %v2244_v35, 64  ;;  %vm170_vm10 = vcmp.lt.s32.totalorder %v2244_v35, 96  ;;  %s2052_s14 = smov [#allocation5]  }
   0xd   :  { %s54_s2 = scalar_lea.vmem %s2718_s1, %s53_s29  ;;  %s2163_s28 = sld [smem:[#allocation2 + $0x6]]  ;;  %191 = vmatpush.msra.mxu1 %v2157_v6  ;;  %260 = vmatpush.msra.mxu2 %v2157_v6  ;;  %vm2259_vm12 = vmand %vm169_vm9, %vm170_vm10 }
   0xe   :  { %139 = vmatpush.msra.mxu0 %v112_v5  ;;  %s57_s16 = scalar_lea.vmem %s2718_s1, %s1804_s30  ;;  %s2170_s17 = sld [smem:[#allocation2 + $0x7]]  ;;  %v55_v8 = vld [vmem:[%s54_s2] sm:$0x1]  ;;  %331 = vmatpush.msra.mxu3 %v2157_v6  ;;  %vm147_vm8 = vcmp.eq.s32.totalorder %v146_v39, 0 }
   0xf   :  { %v58_v9 = vld [vmem:[%s57_s16] sm:$0x1]  ;;  %s60_s21 = scalar_lea.vmem %s2718_s1, %s2131_s0  ;;  %192 = vmatpush.msra.mxu1 %v2175_v7  ;;  %261 = vmatpush.msra.mxu2 %v2175_v7  ;;  %s1766_s2 = sshll.u32 %s2728_s11, 4  ;;  %s1767_s2 = int_to_ptr.hbm [resolvable:$true] %s1766_s2 }
  0x10   :  { %v61_v11 = vld [vmem:[%s60_s21] sm:$0x1]  ;;  %s63_s26 = scalar_lea.vmem %s2718_s1, %s2133_s15  ;;  %v78_v12 = vrot.slane %v58_v9, 7  ;;  %400 = vmatpush.msrb.mxu0 %v2138_v3  ;;  %1812 = vmatmul.msk.f32.vlgmr.msra.gmra.mxu1 %vm120_vm3, %v172_v10  ;;  %s2053_s11 = smov [#allocation8]  }
  0x11   :  { %v64_v13 = vld [vmem:[%s63_s26] sm:$0x1]  ;;  %s66_s5 = scalar_lea.vmem %s2718_s1, %s2148_s22  ;;  %v81_v14 = vrot.slane %v61_v11, 6  ;;  %332 = vmatpush.msra.mxu3 %v2175_v7  ;;  %471 = vmatpush.msrb.mxu1 %v2138_v3 }
  0x12   :  { %v67_v15 = vld [vmem:[%s66_s5] sm:$0x1]  ;;  %s69_s13 = scalar_lea.vmem %s2718_s1, %s2152_s23  ;;  %v84_v16 = vrot.slane %v64_v13, 5  ;;  %v99_v17 = vsel %vm98_vm0, %v55_v8, %v78_v12  ;;  %401 = vmatpush.msrb.mxu0 %v2143_v4  ;;  %542 = vmatpush.msrb.mxu2 %v2138_v3 }
  0x13   :  { %v70_v18 = vld [vmem:[%s69_s13] sm:$0x1]  ;;  %s72_s16 = scalar_lea.vmem %s2718_s1, %s2163_s28  ;;  %v87_v19 = vrot.slane %v67_v15, 4  ;;  %v101_v20 = vsel %vm100_vm1, %v99_v17, %v81_v14  ;;  %613 = vmatpush.msrb.mxu3 %v2138_v3  ;;  %472 = vmatpush.msrb.mxu1 %v2143_v4  ;;  %s2051_s13 = smov [#allocation6]  }
  0x14   :  { %v73_v21 = vld [vmem:[%s72_s16] sm:$0x1]  ;;  %s75_s19 = scalar_lea.vmem %s2718_s1, %s2170_s17  ;;  %v90_v22 = vrot.slane %v70_v18, 3  ;;  %v103_v23 = vsel %vm102_vm2, %v101_v20, %v84_v16  ;;  %402 = vmatpush.msrb.mxu0 %v2157_v6  ;;  %543 = vmatpush.msrb.mxu2 %v2143_v4  ;;  %s1764_s22 = sshll.u32 %s2051_s13, 4  ;;  %s1765_s22 = int_to_ptr.vmem [resolvable:$true] %s1764_s22 }
  0x15   :  { %v76_v24 = vld [vmem:[%s75_s19] sm:$0x1]  ;;  %v93_v25 = vrot.slane %v73_v21, 2  ;;  %v105_v26 = vsel %vm104_vm4, %v103_v23, %v87_v19  ;;  %614 = vmatpush.msrb.mxu3 %v2143_v4  ;;  %473 = vmatpush.msrb.mxu1 %v2157_v6  ;;  %s1753_s16 = sshll.u32 %s2052_s14, 4  ;;  %s1755_s19 = sshll.u32 %s2727_s10, 4  ;;  %s1754_s16 = int_to_ptr.vmem [resolvable:$true] %s1753_s16  ;;  %s1756_s19 = int_to_ptr.hbm [resolvable:$true] %s1755_s19 }
  0x16   :  { %v96_v27 = vrot.slane %v76_v24, 1  ;;  %v107_v28 = vsel %vm106_vm5, %v105_v26, %v90_v22  ;;  %403 = vmatpush.msrb.mxu0 %v2175_v7  ;;  %544 = vmatpush.msrb.mxu2 %v2157_v6  ;;  %s1775_s1 = sshll.u32 %s2053_s11, 4  ;;  %s1777_s17 = sshll.u32 %s2729_s12, 4  ;;  %s1776_s1 = int_to_ptr.vmem [resolvable:$true] %s1775_s1  ;;  %s1778_s17 = int_to_ptr.hbm [resolvable:$true] %s1777_s17 }
  0x17   :  { %v109_v29 = vsel %vm108_vm6, %v107_v28, %v93_v25  ;;  %615 = vmatpush.msrb.mxu3 %v2157_v6  ;;  %474 = vmatpush.msrb.mxu1 %v2175_v7 }
  0x18   :  { %v111_v30 = vsel %vm110_vm7, %v109_v29, %v96_v27  ;;  %545 = vmatpush.msrb.mxu2 %v2175_v7 }
  0x19   :  { %1811 = vmatmul.msk.f32.vlgmr.msra.gmra.mxu0 %vm120_vm3, %v111_v30  ;;  %616 = vmatpush.msrb.mxu3 %v2175_v7 }
  0x1a   :  { %684 = vmatpush.msra.mxu0 %v2138_v3  ;;  %v1889_v3 = vld [vmem:[%s2723_s6] ss:$0 sm:$0xff] }
  0x1c   :  { %685 = vmatpush.msra.mxu0 %v2143_v4 }
  0x1e   :  { %686 = vmatpush.msra.mxu0 %v2157_v6 }
  0x20   :  { %687 = vmatpush.msra.mxu0 %v2175_v7 }
  0x8d   :  { %v194_v47 = vpop.f32.mrf.mxu1 }
  0x96   :  { %v141_v33 = vpop.f32.mrf.mxu0 }
  0x97   :  { %v142_v34 = vadd.f32 %v1888_v31, %v141_v33 }
  0x99   :  { %v149_v36 = vrot.slane %v142_v34, 7  ;;  %v151_v37 = vrot.slane %v142_v34, 5  ;;  %v153_v38 = vrot.slane %v142_v34, 3  ;;  %v155_v40 = vrot.slane %v142_v34, 1 }
  0x9b   :  { %v157_v41 = vsel %vm98_vm0, %v149_v36, %v151_v37 }
  0x9c   :  { %v158_v42 = vsel %vm100_vm1, %v157_v41, %v153_v38 }
  0x9d   :  { %v159_v43 = vsel %vm102_vm2, %v158_v42, %v155_v40 }
  0x9e   :  { %v160_v44 = vsel %vm104_vm4, %v159_v43, %v149_v36 }
  0x9f   :  { %v161_v45 = vsel %vm106_vm5, %v160_v44, %v151_v37 }
  0xa0   :  { %v162_v46 = vsel %vm108_vm6, %v161_v45, %v153_v38 }
  0xa1   :  { %v163_v48 = vsel %vm110_vm7, %v162_v46, %v155_v40 }
  0xa2   :  { %v2254_v49 = vsel %vm147_vm8, %v142_v34, %v163_v48 }
  0xa3   :  { %v197_v50 = vadd.f32 %v194_v47, %v2254_v49 }
  0xa5   :  { %v1813_v51 = vmul.f32 -1.442695, %v197_v50 }
  0xa7   :  { %1891 = vpow2.f32 %v1813_v51 }
  0xad   :  { %v1892_v52 = vpop.eup %1891 }
  0xae   :  { %v202_v53 = vadd.f32 1.0, %v1892_v52 }
  0xb0   :  { %1893 = vrcp.f32 %v202_v53  ;;  %v214_v57 = vand.u32 2147483648, %v202_v53  ;;  %v212_v59 = vand.u32 2147483647, %v202_v53  ;;  %vm208_vm13 = vweird.f32 %v202_v53 }
  0xb1   :  { %1895 = vtanh.f32 %v197_v50 }
  0xb2   :  { %v215_v62 = vor.u32 1.1754944e-38, %v214_v57  ;;  %vm213_vm15 = vcmp.eq.f32.partialorder %v212_v59, 8.507059e+37 }
  0xb6   :  { %v1894_v54 = vpop.eup %1893 }
  0xb7   :  { %v204_v55 = vmul.f32 %v1894_v54, %v202_v53  ;;  %vm209_vm11 = vweird.f32 %v1894_v54  ;;  %v1896_v0 = vpop.eup %1895 }
  0xb8   :  { %vm210_vm14 = vmor %vm208_vm13, %vm209_vm11 }
  0xb9   :  { %v205_v56 = vsub.f32 1.0, %v204_v55 }
  0xbb   :  { %v206_v58 = vmul.f32 %v1894_v54, %v205_v56 }
  0xbd   :  { %v207_v61 = vadd.f32 %v1894_v54, %v206_v58 }
  0xbf   :  { %v211_v63 = vsel %vm210_vm14, %v1894_v54, %v207_v61 }
  0xc0   :  { %v216_v1 = vsel %vm213_vm15, %v215_v62, %v211_v63 }
  0xc1   :  { %v218_v2 = vsel %vm2259_vm12, %v1896_v0, %v216_v1 }
  0xc2   :  { %226 = vrot.lane.b32.xlu0 %v218_v2, %s2046_s4 }
  0xca   :  { %221 = vrot.lane.b32.xlu0 %v1889_v3, %s2047_s20 }
 0x134   :  { %v227_v4 = vpop.permute.xlu0 %226 }
 0x135   :  { %v229_v5 = vmul.f32 %v227_v4, %v218_v2 }
 0x137   :  { %231 = vrot.lane.b32.xlu1 %v229_v5, %s2047_s20 }
 0x13c   :  { %v222_v6 = vpop.permute.xlu0 %221 }
 0x13d   :  { %v224_v7 = vmul.f32 %v222_v6, %v218_v2 }
 0x1a9   :  { %v232_v8 = vpop.permute.xlu1 %231 }
 0x1aa   :  { %v234_v9 = vadd.f32 %v232_v8, %v224_v7 }
 0x1ac   :  { %1897 = vtanh.f32 %v234_v9  ;;  %v292_v36 = vrot.slane %v234_v9, 7 }
 0x1b2   :  { %v1898_v10 = vpop.eup %1897 }
 0x1b3   :  { %237 = vrot.lane.b32.xlu1 %v1898_v10, %s2046_s4 }
 0x225   :  { %v238_v11 = vpop.permute.xlu1 %237 }
 0x226   :  { %v2272_v12 = vmul.f32 %v238_v11, %v218_v2 }
 0x228   :  { %242 = vrot.lane.b32.xlu2 %v2272_v12, %s2047_s20 }
 0x282   :  { %v243_v13 = vpop.permute.xlu2 %242 }
 0x283   :  { %1814 = vmatmul.msk.f32.vlgmr.msra.gmra.mxu2 %vm120_vm3, %v243_v13 }
 0x306   :  { %v263_v14 = vpop.f32.mrf.mxu2 }
 0x307   :  { %v267_v15 = vrot.slane %v263_v14, 7 }
 0x309   :  { %v269_v16 = vadd.f32 %v267_v15, %v2254_v49 }
 0x30b   :  { %v1815_v17 = vmul.f32 -1.442695, %v269_v16 }
 0x30d   :  { %1899 = vpow2.f32 %v1815_v17 }
 0x313   :  { %v1900_v18 = vpop.eup %1899 }
 0x314   :  { %v274_v19 = vadd.f32 1.0, %v1900_v18 }
 0x316   :  { %1901 = vrcp.f32 %v274_v19  ;;  %v286_v23 = vand.u32 2147483648, %v274_v19  ;;  %v284_v25 = vand.u32 2147483647, %v274_v19  ;;  %vm280_vm9 = vweird.f32 %v274_v19 }
 0x317   :  { %1903 = vtanh.f32 %v269_v16 }
 0x318   :  { %v287_v27 = vor.u32 1.1754944e-38, %v286_v23  ;;  %vm285_vm11 = vcmp.eq.f32.partialorder %v284_v25, 8.507059e+37 }
 0x31c   :  { %v1902_v20 = vpop.eup %1901 }
 0x31d   :  { %v276_v21 = vmul.f32 %v1902_v20, %v274_v19  ;;  %vm281_vm8 = vweird.f32 %v1902_v20  ;;  %v1904_v29 = vpop.eup %1903 }
 0x31e   :  { %vm282_vm10 = vmor %vm280_vm9, %vm281_vm8 }
 0x31f   :  { %v277_v22 = vsub.f32 1.0, %v276_v21 }
 0x321   :  { %v278_v24 = vmul.f32 %v1902_v20, %v277_v22 }
 0x323   :  { %v279_v26 = vadd.f32 %v1902_v20, %v278_v24 }
 0x325   :  { %v283_v28 = vsel %vm282_vm10, %v1902_v20, %v279_v26 }
 0x326   :  { %v288_v30 = vsel %vm285_vm11, %v287_v27, %v283_v28 }
 0x327   :  { %v290_v31 = vsel %vm2259_vm12, %v1904_v29, %v288_v30 }
 0x328   :  { %296 = vrot.lane.b32.xlu2 %v290_v31, %s2046_s4  ;;  %v294_v37 = vmul.f32 %v292_v36, %v290_v31 }
 0x382   :  { %v297_v33 = vpop.permute.xlu2 %296 }
 0x383   :  { %v299_v34 = vmul.f32 %v297_v33, %v290_v31 }
 0x385   :  { %301 = vrot.lane.b32.xlu0 %v299_v34, %s2047_s20 }
 0x3f7   :  { %v302_v38 = vpop.permute.xlu0 %301 }
 0x3f8   :  { %v304_v39 = vadd.f32 %v302_v38, %v294_v37 }
 0x3fa   :  { %1905 = vtanh.f32 %v304_v39  ;;  %v363_v3 = vrot.slane %v304_v39, 7 }
 0x400   :  { %v1906_v40 = vpop.eup %1905 }
 0x401   :  { %307 = vrot.lane.b32.xlu1 %v1906_v40, %s2046_s4 }
 0x473   :  { %v308_v41 = vpop.permute.xlu1 %307 }
 0x474   :  { %v2283_v42 = vmul.f32 %v308_v41, %v290_v31 }
 0x476   :  { %v312_v43 = vrot.slane %v2283_v42, 1  ;;  %v737_v10 = vsel %vm98_vm0, %v2272_v12, %v2283_v42 }
 0x478   :  { %313 = vrot.lane.b32.xlu2 %v312_v43, %s2047_s20 }
 0x4d2   :  { %v314_v44 = vpop.permute.xlu2 %313 }
 0x4d3   :  { %1816 = vmatmul.msk.f32.vlgmr.msra.gmra.mxu3 %vm120_vm3, %v314_v44 }
 0x556   :  { %v334_v45 = vpop.f32.mrf.mxu3 }
 0x557   :  { %v338_v46 = vrot.slane %v334_v45, 6 }
 0x559   :  { %v340_v47 = vadd.f32 %v338_v46, %v2254_v49 }
 0x55b   :  { %v1817_v48 = vmul.f32 -1.442695, %v340_v47 }
 0x55d   :  { %1907 = vpow2.f32 %v1817_v48 }
 0x563   :  { %v1908_v50 = vpop.eup %1907 }
 0x564   :  { %v345_v51 = vadd.f32 1.0, %v1908_v50 }
 0x566   :  { %1909 = vrcp.f32 %v345_v51  ;;  %v357_v55 = vand.u32 2147483648, %v345_v51  ;;  %v355_v57 = vand.u32 2147483647, %v345_v51  ;;  %vm351_vm14 = vweird.f32 %v345_v51 }
 0x567   :  { %1911 = vtanh.f32 %v340_v47 }
 0x568   :  { %v358_v59 = vor.u32 1.1754944e-38, %v357_v55  ;;  %vm356_vm8 = vcmp.eq.f32.partialorder %v355_v57, 8.507059e+37 }
 0x56c   :  { %v1910_v52 = vpop.eup %1909 }
 0x56d   :  { %v347_v53 = vmul.f32 %v1910_v52, %v345_v51  ;;  %vm352_vm13 = vweird.f32 %v1910_v52  ;;  %v1912_v62 = vpop.eup %1911 }
 0x56e   :  { %vm353_vm15 = vmor %vm351_vm14, %vm352_vm13 }
 0x56f   :  { %v348_v54 = vsub.f32 1.0, %v347_v53 }
 0x571   :  { %v349_v56 = vmul.f32 %v1910_v52, %v348_v54 }
 0x573   :  { %v350_v58 = vadd.f32 %v1910_v52, %v349_v56 }
 0x575   :  { %v354_v61 = vsel %vm353_vm15, %v1910_v52, %v350_v58 }
 0x576   :  { %v359_v63 = vsel %vm356_vm8, %v358_v59, %v354_v61 }
 0x577   :  { %v361_v0 = vsel %vm2259_vm12, %v1912_v62, %v359_v63 }
 0x578   :  { %367 = vrot.lane.b32.xlu0 %v361_v0, %s2046_s4  ;;  %v365_v4 = vmul.f32 %v363_v3, %v361_v0 }
 0x5ea   :  { %v368_v1 = vpop.permute.xlu0 %367 }
 0x5eb   :  { %v370_v2 = vmul.f32 %v368_v1, %v361_v0 }
 0x5ed   :  { %372 = vrot.lane.b32.xlu1 %v370_v2, %s2047_s20 }
 0x65f   :  { %v373_v5 = vpop.permute.xlu1 %372 }
 0x660   :  { %v375_v6 = vadd.f32 %v373_v5, %v365_v4 }
 0x662   :  { %1913 = vtanh.f32 %v375_v6  ;;  %v434_v37 = vrot.slane %v375_v6, 7 }
 0x668   :  { %v1914_v7 = vpop.eup %1913 }
 0x669   :  { %378 = vrot.lane.b32.xlu2 %v1914_v7, %s2046_s4 }
 0x6c3   :  { %v379_v8 = vpop.permute.xlu2 %378 }
 0x6c4   :  { %v2294_v9 = vmul.f32 %v379_v8, %v361_v0 }
 0x6c6   :  { %v738_v11 = vsel %vm100_vm1, %v737_v10, %v2294_v9  ;;  %v383_v13 = vrot.slane %v2294_v9, 2 }
 0x6c8   :  { %384 = vrot.lane.b32.xlu0 %v383_v13, %s2047_s20 }
 0x73a   :  { %v385_v14 = vpop.permute.xlu0 %384 }
 0x73b   :  { %1818 = vmatmul.msk.f32.vlgmr.msrb.gmra.mxu0 %vm120_vm3, %v385_v14 }
 0x7b8   :  { %v405_v15 = vpop.f32.mrf.mxu0 }
 0x7b9   :  { %v409_v16 = vrot.slane %v405_v15, 5 }
 0x7bb   :  { %v411_v17 = vadd.f32 %v409_v16, %v2254_v49 }
 0x7bd   :  { %v1819_v18 = vmul.f32 -1.442695, %v411_v17 }
 0x7bf   :  { %1915 = vpow2.f32 %v1819_v18 }
 0x7c5   :  { %v1916_v19 = vpop.eup %1915 }
 0x7c6   :  { %v416_v20 = vadd.f32 1.0, %v1916_v19 }
 0x7c8   :  { %1917 = vrcp.f32 %v416_v20  ;;  %v428_v24 = vand.u32 2147483648, %v416_v20  ;;  %v426_v26 = vand.u32 2147483647, %v416_v20  ;;  %vm422_vm10 = vweird.f32 %v416_v20 }
 0x7c9   :  { %1919 = vtanh.f32 %v411_v17 }
 0x7ca   :  { %v429_v28 = vor.u32 1.1754944e-38, %v428_v24  ;;  %vm427_vm13 = vcmp.eq.f32.partialorder %v426_v26, 8.507059e+37 }
 0x7ce   :  { %v1918_v21 = vpop.eup %1917 }
 0x7cf   :  { %v418_v22 = vmul.f32 %v1918_v21, %v416_v20  ;;  %vm423_vm9 = vweird.f32 %v1918_v21  ;;  %v1920_v30 = vpop.eup %1919 }
 0x7d0   :  { %vm424_vm11 = vmor %vm422_vm10, %vm423_vm9 }
 0x7d1   :  { %v419_v23 = vsub.f32 1.0, %v418_v22 }
 0x7d3   :  { %v420_v25 = vmul.f32 %v1918_v21, %v419_v23 }
 0x7d5   :  { %v421_v27 = vadd.f32 %v1918_v21, %v420_v25 }
 0x7d7   :  { %v425_v29 = vsel %vm424_vm11, %v1918_v21, %v421_v27 }
 0x7d8   :  { %v430_v31 = vsel %vm427_vm13, %v429_v28, %v425_v29 }
 0x7d9   :  { %v432_v33 = vsel %vm2259_vm12, %v1920_v30, %v430_v31 }
 0x7da   :  { %438 = vrot.lane.b32.xlu1 %v432_v33, %s2046_s4  ;;  %v436_v38 = vmul.f32 %v434_v37, %v432_v33 }
 0x84c   :  { %v439_v34 = vpop.permute.xlu1 %438 }
 0x84d   :  { %v441_v36 = vmul.f32 %v439_v34, %v432_v33 }
 0x84f   :  { %443 = vrot.lane.b32.xlu2 %v441_v36, %s2047_s20 }
 0x8a9   :  { %v444_v39 = vpop.permute.xlu2 %443 }
 0x8aa   :  { %v446_v40 = vadd.f32 %v444_v39, %v436_v38 }
 0x8ac   :  { %1921 = vtanh.f32 %v446_v40  ;;  %v505_v6 = vrot.slane %v446_v40, 7 }
 0x8b2   :  { %v1922_v41 = vpop.eup %1921 }
 0x8b3   :  { %449 = vrot.lane.b32.xlu0 %v1922_v41, %s2046_s4 }
 0x925   :  { %v450_v43 = vpop.permute.xlu0 %449 }
 0x926   :  { %v2310_v44 = vmul.f32 %v450_v43, %v432_v33 }
 0x928   :  { %v739_v45 = vsel %vm102_vm2, %v738_v11, %v2310_v44  ;;  %v454_v46 = vrot.slane %v2310_v44, 3 }
 0x92a   :  { %455 = vrot.lane.b32.xlu1 %v454_v46, %s2047_s20 }
 0x99c   :  { %v456_v47 = vpop.permute.xlu1 %455 }
 0x99d   :  { %1820 = vmatmul.msk.f32.vlgmr.msrb.gmra.mxu1 %vm120_vm3, %v456_v47 }
 0xa1a   :  { %v476_v48 = vpop.f32.mrf.mxu1 }
 0xa1b   :  { %v480_v50 = vrot.slane %v476_v48, 4 }
 0xa1d   :  { %v482_v51 = vadd.f32 %v480_v50, %v2254_v49 }
 0xa1f   :  { %v1821_v52 = vmul.f32 -1.442695, %v482_v51 }
 0xa21   :  { %1923 = vpow2.f32 %v1821_v52 }
 0xa27   :  { %v1924_v53 = vpop.eup %1923 }
 0xa28   :  { %v487_v54 = vadd.f32 1.0, %v1924_v53 }
 0xa2a   :  { %1925 = vrcp.f32 %v487_v54  ;;  %v499_v58 = vand.u32 2147483648, %v487_v54  ;;  %v497_v61 = vand.u32 2147483647, %v487_v54  ;;  %vm493_vm15 = vweird.f32 %v487_v54 }
 0xa2b   :  { %1927 = vtanh.f32 %v482_v51 }
 0xa2c   :  { %v500_v63 = vor.u32 1.1754944e-38, %v499_v58  ;;  %vm498_vm9 = vcmp.eq.f32.partialorder %v497_v61, 8.507059e+37 }
 0xa30   :  { %v1926_v55 = vpop.eup %1925 }
 0xa31   :  { %v489_v56 = vmul.f32 %v1926_v55, %v487_v54  ;;  %vm494_vm14 = vweird.f32 %v1926_v55  ;;  %v1928_v1 = vpop.eup %1927 }
 0xa32   :  { %vm495_vm8 = vmor %vm493_vm15, %vm494_vm14 }
 0xa33   :  { %v490_v57 = vsub.f32 1.0, %v489_v56 }
 0xa35   :  { %v491_v59 = vmul.f32 %v1926_v55, %v490_v57 }
 0xa37   :  { %v492_v62 = vadd.f32 %v1926_v55, %v491_v59 }
 0xa39   :  { %v496_v0 = vsel %vm495_vm8, %v1926_v55, %v492_v62 }
 0xa3a   :  { %v501_v2 = vsel %vm498_vm9, %v500_v63, %v496_v0 }
 0xa3b   :  { %v503_v3 = vsel %vm2259_vm12, %v1928_v1, %v501_v2 }
 0xa3c   :  { %509 = vrot.lane.b32.xlu2 %v503_v3, %s2046_s4  ;;  %v507_v7 = vmul.f32 %v505_v6, %v503_v3 }
 0xa96   :  { %v510_v4 = vpop.permute.xlu2 %509 }
 0xa97   :  { %v512_v5 = vmul.f32 %v510_v4, %v503_v3 }
 0xa99   :  { %514 = vrot.lane.b32.xlu0 %v512_v5, %s2047_s20 }
 0xb0b   :  { %v515_v8 = vpop.permute.xlu0 %514 }
 0xb0c   :  { %v517_v10 = vadd.f32 %v515_v8, %v507_v7 }
 0xb0e   :  { %1929 = vtanh.f32 %v517_v10  ;;  %v576_v40 = vrot.slane %v517_v10, 7 }
 0xb14   :  { %v1930_v11 = vpop.eup %1929 }
 0xb15   :  { %520 = vrot.lane.b32.xlu1 %v1930_v11, %s2046_s4 }
 0xb87   :  { %v521_v13 = vpop.permute.xlu1 %520 }
 0xb88   :  { %v2323_v14 = vmul.f32 %v521_v13, %v503_v3 }
 0xb8a   :  { %v740_v15 = vsel %vm104_vm4, %v739_v45, %v2323_v14  ;;  %v525_v16 = vrot.slane %v2323_v14, 4 }
 0xb8c   :  { %526 = vrot.lane.b32.xlu2 %v525_v16, %s2047_s20 }
 0xbe6   :  { %v527_v17 = vpop.permute.xlu2 %526 }
 0xbe7   :  { %1822 = vmatmul.msk.f32.vlgmr.msrb.gmra.mxu2 %vm120_vm3, %v527_v17 }
 0xc6a   :  { %v547_v18 = vpop.f32.mrf.mxu2 }
 0xc6b   :  { %v551_v19 = vrot.slane %v547_v18, 3 }
 0xc6d   :  { %v553_v20 = vadd.f32 %v551_v19, %v2254_v49 }
 0xc6f   :  { %v1823_v21 = vmul.f32 -1.442695, %v553_v20 }
 0xc71   :  { %1931 = vpow2.f32 %v1823_v21 }
 0xc77   :  { %v1932_v22 = vpop.eup %1931 }
 0xc78   :  { %v558_v23 = vadd.f32 1.0, %v1932_v22 }
 0xc7a   :  { %1933 = vrcp.f32 %v558_v23  ;;  %v570_v27 = vand.u32 2147483648, %v558_v23  ;;  %v568_v29 = vand.u32 2147483647, %v558_v23  ;;  %vm564_vm11 = vweird.f32 %v558_v23 }
 0xc7b   :  { %1935 = vtanh.f32 %v553_v20 }
 0xc7c   :  { %v571_v31 = vor.u32 1.1754944e-38, %v570_v27  ;;  %vm569_vm14 = vcmp.eq.f32.partialorder %v568_v29, 8.507059e+37 }
 0xc80   :  { %v1934_v24 = vpop.eup %1933 }
 0xc81   :  { %v560_v25 = vmul.f32 %v1934_v24, %v558_v23  ;;  %vm565_vm10 = vweird.f32 %v1934_v24  ;;  %v1936_v34 = vpop.eup %1935 }
 0xc82   :  { %vm566_vm13 = vmor %vm564_vm11, %vm565_vm10 }
 0xc83   :  { %v561_v26 = vsub.f32 1.0, %v560_v25 }
 0xc85   :  { %v562_v28 = vmul.f32 %v1934_v24, %v561_v26 }
 0xc87   :  { %v563_v30 = vadd.f32 %v1934_v24, %v562_v28 }
 0xc89   :  { %v567_v33 = vsel %vm566_vm13, %v1934_v24, %v563_v30 }
 0xc8a   :  { %v572_v36 = vsel %vm569_vm14, %v571_v31, %v567_v33 }
 0xc8b   :  { %v574_v37 = vsel %vm2259_vm12, %v1936_v34, %v572_v36 }
 0xc8c   :  { %580 = vrot.lane.b32.xlu0 %v574_v37, %s2046_s4  ;;  %v578_v41 = vmul.f32 %v576_v40, %v574_v37 }
 0xcfe   :  { %v581_v38 = vpop.permute.xlu0 %580 }
 0xcff   :  { %v583_v39 = vmul.f32 %v581_v38, %v574_v37 }
 0xd01   :  { %585 = vrot.lane.b32.xlu1 %v583_v39, %s2047_s20 }
 0xd73   :  { %v586_v43 = vpop.permute.xlu1 %585 }
 0xd74   :  { %v588_v45 = vadd.f32 %v586_v43, %v578_v41 }
 0xd76   :  { %1937 = vtanh.f32 %v588_v45  ;;  %v647_v11 = vrot.slane %v588_v45, 7 }
 0xd7c   :  { %v1938_v46 = vpop.eup %1937 }
 0xd7d   :  { %591 = vrot.lane.b32.xlu2 %v1938_v46, %s2046_s4 }
 0xdd7   :  { %v592_v47 = vpop.permute.xlu2 %591 }
 0xdd8   :  { %v2336_v48 = vmul.f32 %v592_v47, %v574_v37 }
 0xdda   :  { %v741_v50 = vsel %vm106_vm5, %v740_v15, %v2336_v48  ;;  %v596_v51 = vrot.slane %v2336_v48, 5 }
 0xddc   :  { %597 = vrot.lane.b32.xlu0 %v596_v51, %s2047_s20 }
 0xe4e   :  { %v598_v52 = vpop.permute.xlu0 %597 }
 0xe4f   :  { %1824 = vmatmul.msk.f32.vlgmr.msrb.gmra.mxu3 %vm120_vm3, %v598_v52 }
 0xed2   :  { %v618_v53 = vpop.f32.mrf.mxu3 }
 0xed3   :  { %v622_v54 = vrot.slane %v618_v53, 2 }
 0xed5   :  { %v624_v55 = vadd.f32 %v622_v54, %v2254_v49 }
 0xed7   :  { %v1825_v56 = vmul.f32 -1.442695, %v624_v55 }
 0xed9   :  { %1939 = vpow2.f32 %v1825_v56 }
 0xedf   :  { %v1940_v57 = vpop.eup %1939 }
 0xee0   :  { %v629_v58 = vadd.f32 1.0, %v1940_v57  ;;  %v749_v57 = vrot.slane %v2336_v48, 3  ;;  %v759_v48 = vrot.slane %v2272_v12, 1  ;;  %v779_v12 = vld [vmem:[%s2724_s7 + $0x8] sm:$0xff] }
 0xee2   :  { %1941 = vrcp.f32 %v629_v58  ;;  %v641_v63 = vand.u32 2147483648, %v629_v58  ;;  %v639_v1 = vand.u32 2147483647, %v629_v58  ;;  %vm635_vm8 = vweird.f32 %v629_v58 }
 0xee3   :  { %1943 = vtanh.f32 %v624_v55 }
 0xee4   :  { %v642_v3 = vor.u32 1.1754944e-38, %v641_v63  ;;  %vm640_vm10 = vcmp.eq.f32.partialorder %v639_v1, 8.507059e+37  ;;  %v755_v63 = vrot.slane %v2294_v9, 5  ;;  %v757_v1 = vrot.slane %v2283_v42, 3  ;;  %v781_v9 = vld [vmem:[%s2724_s7 + $0x18] sm:$0xff]  ;;  %v780_v42 = vld [vmem:[%s2724_s7 + $0x10] sm:$0xff] }
 0xee5   :  { %801 = vmatpush.msra.mxu1 %v781_v9 }
 0xee7   :  { %802 = vmatpush.msra.mxu1 %v780_v42 }
 0xee8   :  { %v1942_v59 = vpop.eup %1941 }
 0xee9   :  { %v631_v61 = vmul.f32 %v1942_v59, %v629_v58  ;;  %vm636_vm15 = vweird.f32 %v1942_v59  ;;  %v1944_v5 = vpop.eup %1943  ;;  %v751_v58 = vrot.slane %v2323_v14, 1  ;;  %803 = vmatpush.msra.mxu1 %v779_v12 }
 0xeea   :  { %vm637_vm9 = vmor %vm635_vm8, %vm636_vm15 }
 0xeeb   :  { %v632_v62 = vsub.f32 1.0, %v631_v61  ;;  %v753_v61 = vrot.slane %v2310_v44, 7  ;;  %v778_v44 = vld [vmem:[%s2724_s7] sm:$0xff] }
 0xeec   :  { %804 = vmatpush.msra.mxu1 %v778_v44 }
 0xeed   :  { %v633_v0 = vmul.f32 %v1942_v59, %v632_v62 }
 0xeef   :  { %v634_v2 = vadd.f32 %v1942_v59, %v633_v0 }
 0xef1   :  { %v638_v4 = vsel %vm637_vm9, %v1942_v59, %v634_v2 }
 0xef2   :  { %v643_v6 = vsel %vm640_vm10, %v642_v3, %v638_v4 }
 0xef3   :  { %v645_v7 = vsel %vm2259_vm12, %v1944_v5, %v643_v6  ;;  %v2387_v5 = vshrl.u32 %v144_v32, 7  ;;  %v809_v6 = vld [vmem:[%s2726_s9] sm:$0x1f] }
 0xef4   :  { %651 = vrot.lane.b32.xlu1 %v645_v7, %s2046_s4  ;;  %v649_v13 = vmul.f32 %v647_v11, %v645_v7  ;;  %1830 = vmatpush.msk.msra.mxu2 %vm106_vm5, %v809_v6  ;;  %v828_v11 = vperm.slane %v809_v6, 0 }
 0xef5   :  { %1833 = vmatpush.msk.msra.mxu3 %vm106_vm5, %v809_v6  ;;  %1862 = vset.pattern.permute.xlu0 %v2387_v5 }
 0xef6   :  { %1863 = vset.pattern.permute.xlu2 %v2387_v5  ;;  %1836 = vmatpush.msk.msrb.mxu0 %vm106_vm5, %v809_v6 }
 0xef7   :  { %1839 = vmatpush.msk.msrb.mxu1 %vm106_vm5, %v809_v6  ;;  %1842 = vmatpush.msk.msrb.mxu2 %vm106_vm5, %v809_v6 }
 0xef8   :  { %1845 = vmatpush.msk.msrb.mxu3 %vm106_vm5, %v809_v6 }
 0xf66   :  { %v652_v8 = vpop.permute.xlu1 %651 }
 0xf67   :  { %v654_v10 = vmul.f32 %v652_v8, %v645_v7 }
 0xf69   :  { %656 = vrot.lane.b32.xlu2 %v654_v10, %s2047_s20 }
 0xfc3   :  { %v657_v15 = vpop.permute.xlu2 %656 }
 0xfc4   :  { %v659_v16 = vadd.f32 %v657_v15, %v649_v13  ;;  %v835_v13 = vperm.slane %v809_v6, 1  ;;  %v849_v15 = vperm.slane %v809_v6, 3 }
 0xfc6   :  { %1945 = vtanh.f32 %v659_v16  ;;  %v718_v46 = vrot.slane %v659_v16, 7  ;;  %v842_v16 = vperm.slane %v809_v6, 2 }
 0xfcc   :  { %v1946_v17 = vpop.eup %1945 }
 0xfcd   :  { %662 = vrot.lane.b32.xlu0 %v1946_v17, %s2046_s4 }
0x103f   :  { %v663_v18 = vpop.permute.xlu0 %662 }
0x1040   :  { %v665_v19 = vmul.f32 %v663_v18, %v645_v7  ;;  %v2048_v7 = vmov -10000.0  }
0x1042   :  { %v667_v20 = vrot.slane %v665_v19, 6  ;;  %v742_v21 = vsel %vm108_vm6, %v741_v50, %v665_v19  ;;  %v747_v55 = vrot.slane %v665_v19, 5 }
0x1044   :  { %668 = vrot.lane.b32.xlu1 %v667_v20, %s2047_s20  ;;  %v1890_v20 = vld [vmem:[%s2725_s8] ss:$0 sm:$0xff] }
0x10b6   :  { %v669_v22 = vpop.permute.xlu1 %668 }
0x10b7   :  { %1826 = vmatmul.msk.f32.vlgmr.msra.gmra.mxu0 %vm120_vm3, %v669_v22 }
0x10b8   :  { %1848 = vmatpush.msk.msra.mxu0 %vm106_vm5, %v809_v6 }
0x1134   :  { %v689_v23 = vpop.f32.mrf.mxu0 }
0x1135   :  { %v693_v24 = vrot.slane %v689_v23, 1 }
0x1137   :  { %v695_v25 = vadd.f32 %v693_v24, %v2254_v49  ;;  %v856_v24 = vperm.slane %v809_v6, 4 }
0x1139   :  { %v1827_v26 = vmul.f32 -1.442695, %v695_v25 }
0x113b   :  { %1947 = vpow2.f32 %v1827_v26 }
0x1141   :  { %v1948_v27 = vpop.eup %1947 }
0x1142   :  { %v700_v28 = vadd.f32 1.0, %v1948_v27 }
0x1144   :  { %1949 = vrcp.f32 %v700_v28  ;;  %v712_v33 = vand.u32 2147483648, %v700_v28  ;;  %v710_v36 = vand.u32 2147483647, %v700_v28  ;;  %vm706_vm13 = vweird.f32 %v700_v28 }
0x1145   :  { %1951 = vtanh.f32 %v695_v25  ;;  %v2049_v25 = vmov 0  }
0x1146   :  { %v713_v38 = vor.u32 1.1754944e-38, %v712_v33  ;;  %vm711_vm15 = vcmp.eq.f32.partialorder %v710_v36, 8.507059e+37  ;;  %1866 = vset.pattern.permute.xlu1 %v2049_v25 }
0x114a   :  { %v1950_v29 = vpop.eup %1949 }
0x114b   :  { %v702_v30 = vmul.f32 %v1950_v29, %v700_v28  ;;  %vm707_vm11 = vweird.f32 %v1950_v29  ;;  %v1952_v49 = vpop.eup %1951 }
0x114c   :  { %vm708_vm14 = vmor %vm706_vm13, %vm707_vm11  ;;  %vm1241_vm13 = vcmask 39936  }
0x114d   :  { %v703_v31 = vsub.f32 1.0, %v702_v30 }
0x114f   :  { %v704_v34 = vmul.f32 %v1950_v29, %v703_v31 }
0x1151   :  { %v705_v37 = vadd.f32 %v1950_v29, %v704_v34 }
0x1153   :  { %v709_v39 = vsel %vm708_vm14, %v1950_v29, %v705_v37 }
0x1154   :  { %v714_v40 = vsel %vm711_vm15, %v713_v38, %v709_v39 }
0x1155   :  { %v716_v41 = vsel %vm2259_vm12, %v1952_v49, %v714_v40  ;;  %vm1745_vm12 = vcmask 0  }
0x1156   :  { %722 = vrot.lane.b32.xlu2 %v716_v41, %s2046_s4  ;;  %v720_v47 = vmul.f32 %v718_v46, %v716_v41 }
0x11b0   :  { %v723_v43 = vpop.permute.xlu2 %722 }
0x11b1   :  { %v725_v45 = vmul.f32 %v723_v43, %v716_v41 }
0x11b3   :  { %727 = vrot.lane.b32.xlu0 %v725_v45, %s2047_s20 }
0x1225   :  { %v728_v50 = vpop.permute.xlu0 %727 }
0x1226   :  { %v730_v51 = vadd.f32 %v728_v50, %v720_v47 }
0x1228   :  { %1953 = vtanh.f32 %v730_v51 }
0x122e   :  { %v1954_v52 = vpop.eup %1953 }
0x122f   :  { %733 = vrot.lane.b32.xlu1 %v1954_v52, %s2046_s4 }
0x12a1   :  { %v734_v53 = vpop.permute.xlu1 %733 }
0x12a2   :  { %v736_v54 = vmul.f32 %v734_v53, %v716_v41 }
0x12a4   :  { %v745_v56 = vrot.slane %v736_v54, 7  ;;  %v743_v60 = vsel %vm110_vm7, %v742_v21, %v736_v54 }
0x12a5   :  { %770 = vrot.lane.b32.xlu2 %v743_v60, %s2047_s20 }
0x12a6   :  { %v761_v59 = vsel %vm98_vm0, %v745_v56, %v747_v55  ;;  %vm810_vm0 = vcmp.eq.s32.totalorder %v2244_v35, 3 }
0x12a7   :  { %v762_v62 = vsel %vm100_vm1, %v761_v59, %v749_v57  ;;  %v2395_v8 = vsel %vm810_vm0, 0.0, %v2048_v7  ;;  %vm813_vm1 = vcmask 36864  }
0x12a8   :  { %v763_v0 = vsel %vm102_vm2, %v762_v62, %v751_v58  ;;  %v812_v32 = vadd.f32 %v2395_v8, %v809_v6  ;;  %vm768_vm2 = vcmp.lt.s32.totalorder %v2244_v35, 16 }
0x12a9   :  { %v764_v2 = vsel %vm104_vm4, %v763_v0, %v753_v61  ;;  %vm900_vm4 = vcmask 1042434  }
0x12aa   :  { %v765_v3 = vsel %vm106_vm5, %v764_v2, %v755_v63  ;;  %v814_v10 = vsel %vm813_vm1, %v812_v32, -inf }
0x12ab   :  { %v766_v14 = vsel %vm108_vm6, %v765_v3, %v757_v1  ;;  %815 = vmax.xlane.f32.xlu1 %v814_v10  ;;  %vm904_vm6 = vcmask 1044484  }
0x12ac   :  { %v767_v4 = vsel %vm110_vm7, %v766_v14, %v759_v48  ;;  %vm1202_vm7 = vcmask 4096  }
0x12ad   :  { %774 = vrot.lane.b32.xlu0 %v767_v4, %s2047_s20  ;;  %840 = vperm.xlu2 %1863, %v835_v13  }
0x12b5   :  { %833 = vperm.xlu0 %1862, %v828_v11   ;;  %847 = vperm.xlu2 %1863, %v842_v16  }
0x12bd   :  { %854 = vperm.xlu0 %1862, %v849_v15  }
0x12c5   :  { %1864 = vset.pattern.permute.xlu0 %v2049_v25 }
0x12ff   :  { %v771_v17 = vpop.permute.xlu2 %770 }
0x1307   :  { %v2420_v26 = vpop.permute.xlu2 %840 }
0x130f   :  { %v2424_v28 = vpop.permute.xlu2 %847 }
0x131e   :  { %v816_v29 = vpop.xlane.xlu1 %815 }
0x131f   :  { %v775_v18 = vpop.permute.xlu0 %774 }
0x1320   :  { %v777_v19 = vsel %vm768_vm2, %v771_v17, %v775_v18 }
0x1321   :  { %1828 = vmatmul.msk.f32.vlgmr.msra.gmra.mxu1 %vm120_vm3, %v777_v19  ;;  %vm898_vm3 = vcmask 1041409  }
0x1322   :  { %1851 = vmatpush.msk.msra.mxu1 %vm106_vm5, %v809_v6  ;;  %vm902_vm5 = vcmask 1043459  }
0x1327   :  { %v2422_v27 = vpop.permute.xlu0 %833 }
0x132f   :  { %v2426_v31 = vpop.permute.xlu0 %854 }
0x139e   :  { %v806_v21 = vpop.f32.mrf.mxu1 }
0x139f   :  { %v2414_v22 = vadd.f32 %v1890_v20, %v806_v21 }
0x13a1   :  { %v818_v23 = vperm.slane %v2414_v22, 0  ;;  %v910_v40 = vperm.slane %v2414_v22, 1  ;;  %v957_v3 = vperm.slane %v2414_v22, 2 }
0x13a3   :  { %823 = vperm.xlu2 %1863, %v818_v23  }
0x13ab   :  { %861 = vperm.xlu2 %1863, %v856_v24  }
0x13b3   :  { %1865 = vset.pattern.permute.xlu2 %v2049_v25 }
0x13fd   :  { %v824_v30 = vpop.permute.xlu2 %823 }
0x13fe   :  { %v2428_v33 = vadd.f32 %v824_v30, %v816_v29 }
0x1400   :  { %v869_v34 = vadd.f32 %v2420_v26, %v2428_v33  ;;  %v868_v36 = vadd.f32 %v2422_v27, %v2428_v33  ;;  %v871_v37 = vadd.f32 %v2426_v31, %v2428_v33  ;;  %v870_v39 = vadd.f32 %v2424_v28, %v2428_v33 }
0x1402   :  { %882 = vperm.xlu2 %1865, %v869_v34   ;;  %879 = vperm.xlu0 %1864, %v868_v36   ;;  %v1004_v34 = vperm.slane %v2414_v22, 3 }
0x1403   :  { %888 = vperm.xlu1 %1866, %v871_v37  }
0x1405   :  { %v2436_v38 = vpop.permute.xlu2 %861 }
0x1406   :  { %v872_v49 = vadd.f32 %v2436_v38, %v2428_v33 }
0x140a   :  { %885 = vperm.xlu2 %1865, %v870_v39   ;;  %891 = vperm.xlu0 %1864, %v872_v49  }
0x1412   :  { %1867 = vset.pattern.permute.xlu0 %v2387_v5 }
0x141a   :  { %915 = vperm.xlu0 %1867, %v910_v40  }
0x1422   :  { %1868 = vset.pattern.permute.xlu0 %v2049_v25 }
0x145c   :  { %v883_v41 = vpop.permute.xlu2 %882 }
0x145d   :  { %v894_v46 = vperm.slane %v883_v41, %v2244_v35 }
0x1464   :  { %v886_v47 = vpop.permute.xlu2 %885 }
0x1465   :  { %v895_v51 = vperm.slane %v886_v47, %v2244_v35 }
0x1474   :  { %v880_v43 = vpop.permute.xlu0 %879 }
0x1475   :  { %v893_v45 = vperm.slane %v880_v43, %v2244_v35  ;;  %v889_v52 = vpop.permute.xlu1 %888 }
0x1476   :  { %v896_v54 = vperm.slane %v889_v52, %v2244_v35 }
0x1477   :  { %v899_v50 = vsel %vm898_vm3, %v894_v46, %v893_v45 }
0x1478   :  { %v901_v53 = vsel %vm900_vm4, %v895_v51, %v899_v50 }
0x1479   :  { %v903_v60 = vsel %vm902_vm5, %v896_v54, %v901_v53 }
0x147c   :  { %v892_v55 = vpop.permute.xlu0 %891 }
0x147d   :  { %v897_v56 = vperm.slane %v892_v55, %v2244_v35 }
0x147f   :  { %v905_v57 = vsel %vm904_vm6, %v897_v56, %v903_v60 }
0x1480   :  { %v907_v58 = vsel %vm813_vm1, %v905_v57, -inf }
0x1481   :  { %908 = vmax.xlane.f32.xlu2 %v907_v58 }
0x148c   :  { %v916_v59 = vpop.permute.xlu0 %915 }
0x14f4   :  { %v909_v61 = vpop.xlane.xlu2 %908 }
0x14f5   :  { %v2455_v62 = vadd.f32 %v916_v59, %v909_v61 }
0x14f7   :  { %v920_v63 = vadd.f32 %v2455_v62, %v2420_v26  ;;  %v919_v0 = vadd.f32 %v2455_v62, %v2422_v27  ;;  %v923_v1 = vadd.f32 %v2455_v62, %v2436_v38  ;;  %v921_v2 = vadd.f32 %v2455_v62, %v2424_v28 }
0x14f8   :  { %v922_v48 = vadd.f32 %v2455_v62, %v2426_v31 }
0x14f9   :  { %933 = vperm.xlu0 %1868, %v920_v63   ;;  %930 = vperm.xlu1 %1866, %v919_v0   ;;  %v1051_v0 = vperm.slane %v2414_v22, 4 }
0x1501   :  { %942 = vperm.xlu0 %1868, %v923_v1   ;;  %936 = vperm.xlu1 %1866, %v921_v2  }
0x1509   :  { %939 = vperm.xlu1 %1866, %v922_v48  }
0x1511   :  { %1869 = vset.pattern.permute.xlu1 %v2387_v5 }
0x1519   :  { %962 = vperm.xlu1 %1869, %v957_v3  }
0x1521   :  { %1870 = vset.pattern.permute.xlu1 %v2049_v25 }
0x156b   :  { %v931_v14 = vpop.permute.xlu1 %930  ;;  %v934_v4 = vpop.permute.xlu0 %933 }
0x156c   :  { %v945_v42 = vperm.slane %v934_v4, %v2244_v35  ;;  %v944_v12 = vperm.slane %v931_v14, %v2244_v35 }
0x156e   :  { %v949_v32 = vsel %vm898_vm3, %v945_v42, %v944_v12 }
0x1573   :  { %v937_v9 = vpop.permute.xlu1 %936  ;;  %v943_v6 = vpop.permute.xlu0 %942 }
0x1574   :  { %v946_v44 = vperm.slane %v937_v9, %v2244_v35  ;;  %v948_v11 = vperm.slane %v943_v6, %v2244_v35 }
0x1576   :  { %v950_v13 = vsel %vm900_vm4, %v946_v44, %v949_v32 }
0x157b   :  { %v940_v7 = vpop.permute.xlu1 %939 }
0x157c   :  { %v947_v10 = vperm.slane %v940_v7, %v2244_v35 }
0x157e   :  { %v951_v15 = vsel %vm902_vm5, %v947_v10, %v950_v13  ;;  %v1098_v13 = vperm.slane %v2414_v22, 5 }
0x157f   :  { %v952_v16 = vsel %vm904_vm6, %v948_v11, %v951_v15 }
0x1580   :  { %v954_v17 = vsel %vm813_vm1, %v952_v16, -inf }
0x1581   :  { %955 = vmax.xlane.f32.xlu2 %v954_v17 }
0x158b   :  { %v963_v18 = vpop.permute.xlu1 %962 }
0x15f4   :  { %v956_v19 = vpop.xlane.xlu2 %955 }
0x15f5   :  { %v2480_v20 = vadd.f32 %v963_v18, %v956_v19 }
0x15f7   :  { %v968_v21 = vadd.f32 %v2480_v20, %v2424_v28  ;;  %v967_v23 = vadd.f32 %v2480_v20, %v2420_v26  ;;  %v966_v24 = vadd.f32 %v2480_v20, %v2422_v27  ;;  %v970_v29 = vadd.f32 %v2480_v20, %v2436_v38 }
0x15f8   :  { %v969_v30 = vadd.f32 %v2480_v20, %v2426_v31 }
0x15f9   :  { %983 = vperm.xlu1 %1870, %v968_v21   ;;  %980 = vperm.xlu2 %1865, %v967_v23  }
0x15fa   :  { %977 = vperm.xlu0 %1868, %v966_v24  }
0x1601   :  { %989 = vperm.xlu1 %1870, %v970_v29  }
0x1602   :  { %986 = vperm.xlu0 %1868, %v969_v30  }
0x1609   :  { %1871 = vset.pattern.permute.xlu1 %v2387_v5 }
0x1611   :  { %1009 = vperm.xlu1 %1871, %v1004_v34  }
0x1619   :  { %1872 = vset.pattern.permute.xlu1 %v2049_v25 }
0x1653   :  { %v981_v39 = vpop.permute.xlu2 %980 }
0x1654   :  { %v992_v40 = vperm.slane %v981_v39, %v2244_v35 }
0x166b   :  { %v984_v36 = vpop.permute.xlu1 %983 }
0x166c   :  { %v978_v37 = vpop.permute.xlu0 %977  ;;  %v993_v41 = vperm.slane %v984_v36, %v2244_v35 }
0x166d   :  { %v991_v49 = vperm.slane %v978_v37, %v2244_v35 }
0x166f   :  { %v996_v43 = vsel %vm898_vm3, %v992_v40, %v991_v49 }
0x1670   :  { %v997_v51 = vsel %vm900_vm4, %v993_v41, %v996_v43 }
0x1673   :  { %v990_v45 = vpop.permute.xlu1 %989 }
0x1674   :  { %v995_v46 = vperm.slane %v990_v45, %v2244_v35  ;;  %v987_v47 = vpop.permute.xlu0 %986 }
0x1675   :  { %v994_v50 = vperm.slane %v987_v47, %v2244_v35 }
0x1677   :  { %v998_v52 = vsel %vm902_vm5, %v994_v50, %v997_v51 }
0x1678   :  { %v999_v53 = vsel %vm904_vm6, %v995_v46, %v998_v52 }
0x1679   :  { %v1001_v54 = vsel %vm813_vm1, %v999_v53, -inf }
0x167a   :  { %1002 = vmax.xlane.f32.xlu0 %v1001_v54 }
0x1683   :  { %v1010_v55 = vpop.permute.xlu1 %1009 }
0x16ed   :  { %v1003_v56 = vpop.xlane.xlu0 %1002 }
0x16ee   :  { %v2505_v60 = vadd.f32 %v1010_v55, %v1003_v56 }
0x16f0   :  { %v1014_v57 = vadd.f32 %v2505_v60, %v2420_v26  ;;  %v1013_v58 = vadd.f32 %v2505_v60, %v2422_v27  ;;  %v1016_v59 = vadd.f32 %v2505_v60, %v2426_v31  ;;  %v1015_v61 = vadd.f32 %v2505_v60, %v2424_v28 }
0x16f1   :  { %v1017_v63 = vadd.f32 %v2505_v60, %v2436_v38 }
0x16f2   :  { %1027 = vperm.xlu1 %1872, %v1014_v57   ;;  %1024 = vperm.xlu2 %1865, %v1013_v58   ;;  %v1145_v58 = vperm.slane %v2414_v22, 6 }
0x16fa   :  { %1033 = vperm.xlu1 %1872, %v1016_v59   ;;  %1030 = vperm.xlu2 %1865, %v1015_v61  }
0x1702   :  { %1036 = vperm.xlu2 %1865, %v1017_v63   ;;  %1875 = vset.pattern.permute.xlu1 %v2387_v5 }
0x170a   :  { %1873 = vset.pattern.permute.xlu2 %v2387_v5 }
0x1712   :  { %1056 = vperm.xlu2 %1873, %v1051_v0  }
0x171a   :  { %1874 = vset.pattern.permute.xlu2 %v2049_v25 }
0x174c   :  { %v1025_v1 = vpop.permute.xlu2 %1024 }
0x174d   :  { %v1038_v14 = vperm.slane %v1025_v1, %v2244_v35 }
0x1754   :  { %v1031_v2 = vpop.permute.xlu2 %1030 }
0x1755   :  { %v1040_v42 = vperm.slane %v1031_v2, %v2244_v35 }
0x175c   :  { %v1037_v4 = vpop.permute.xlu2 %1036 }
0x175d   :  { %v1042_v6 = vperm.slane %v1037_v4, %v2244_v35 }
0x1764   :  { %v1028_v48 = vpop.permute.xlu1 %1027 }
0x1765   :  { %v1039_v3 = vperm.slane %v1028_v48, %v2244_v35 }
0x1767   :  { %v1043_v9 = vsel %vm898_vm3, %v1039_v3, %v1038_v14 }
0x1768   :  { %v1044_v7 = vsel %vm900_vm4, %v1040_v42, %v1043_v9 }
0x176c   :  { %v1034_v12 = vpop.permute.xlu1 %1033  ;;  %v1057_v15 = vpop.permute.xlu2 %1056 }
0x176d   :  { %v1041_v44 = vperm.slane %v1034_v12, %v2244_v35 }
0x176f   :  { %v1045_v32 = vsel %vm902_vm5, %v1041_v44, %v1044_v7 }
0x1770   :  { %v1046_v10 = vsel %vm904_vm6, %v1042_v6, %v1045_v32 }
0x1771   :  { %v1048_v11 = vsel %vm813_vm1, %v1046_v10, -inf }
0x1772   :  { %1049 = vmax.xlane.f32.xlu1 %v1048_v11 }
0x178b   :  { %1103 = vperm.xlu1 %1875, %v1098_v13  }
0x1793   :  { %1876 = vset.pattern.permute.xlu1 %v2049_v25 }
0x17e5   :  { %v1050_v16 = vpop.xlane.xlu1 %1049 }
0x17e6   :  { %v2533_v17 = vadd.f32 %v1057_v15, %v1050_v16 }
0x17e8   :  { %v1061_v18 = vadd.f32 %v2533_v17, %v2420_v26  ;;  %v1060_v19 = vadd.f32 %v2533_v17, %v2422_v27  ;;  %v1064_v21 = vadd.f32 %v2533_v17, %v2436_v38  ;;  %v1062_v23 = vadd.f32 %v2533_v17, %v2424_v28 }
0x17e9   :  { %v1063_v24 = vadd.f32 %v2533_v17, %v2426_v31 }
0x17ea   :  { %1074 = vperm.xlu0 %1868, %v1061_v18   ;;  %1071 = vperm.xlu2 %1874, %v1060_v19  }
0x17f2   :  { %1083 = vperm.xlu0 %1868, %v1064_v21   ;;  %1077 = vperm.xlu2 %1874, %v1062_v23  }
0x17fa   :  { %1080 = vperm.xlu2 %1874, %v1063_v24  }
0x17fd   :  { %v1104_v52 = vpop.permute.xlu1 %1103 }
0x1844   :  { %v1072_v29 = vpop.permute.xlu2 %1071 }
0x1845   :  { %v1085_v37 = vperm.slane %v1072_v29, %v2244_v35 }
0x184c   :  { %v1078_v30 = vpop.permute.xlu2 %1077 }
0x184d   :  { %v1087_v49 = vperm.slane %v1078_v30, %v2244_v35 }
0x1854   :  { %v1081_v40 = vpop.permute.xlu2 %1080 }
0x1855   :  { %v1088_v43 = vperm.slane %v1081_v40, %v2244_v35 }
0x185c   :  { %v1075_v34 = vpop.permute.xlu0 %1074 }
0x185d   :  { %v1086_v36 = vperm.slane %v1075_v34, %v2244_v35 }
0x185f   :  { %v1090_v39 = vsel %vm898_vm3, %v1086_v36, %v1085_v37 }
0x1860   :  { %v1091_v41 = vsel %vm900_vm4, %v1087_v49, %v1090_v39 }
0x1861   :  { %v1092_v47 = vsel %vm902_vm5, %v1088_v43, %v1091_v41 }
0x1864   :  { %v1084_v45 = vpop.permute.xlu0 %1083 }
0x1865   :  { %v1089_v46 = vperm.slane %v1084_v45, %v2244_v35 }
0x1867   :  { %v1093_v50 = vsel %vm904_vm6, %v1089_v46, %v1092_v47 }
0x1868   :  { %v1095_v51 = vsel %vm813_vm1, %v1093_v50, -inf }
0x1869   :  { %1096 = vmax.xlane.f32.xlu2 %v1095_v51 }
0x18dc   :  { %v1097_v53 = vpop.xlane.xlu2 %1096 }
0x18dd   :  { %v2555_v54 = vadd.f32 %v1104_v52, %v1097_v53 }
0x18df   :  { %v1111_v55 = vadd.f32 %v2555_v54, %v2436_v38  ;;  %v1107_v56 = vadd.f32 %v2555_v54, %v2422_v27  ;;  %v1108_v57 = vadd.f32 %v2555_v54, %v2420_v26  ;;  %v1109_v59 = vadd.f32 %v2555_v54, %v2424_v28 }
0x18e0   :  { %v1110_v61 = vadd.f32 %v2555_v54, %v2426_v31 }
0x18e1   :  { %1130 = vperm.xlu1 %1876, %v1111_v55   ;;  %1118 = vperm.xlu0 %1868, %v1107_v56  }
0x18e9   :  { %1877 = vset.pattern.permute.xlu1 %v2387_v5  ;;  %1121 = vperm.xlu0 %1868, %v1108_v57  }
0x18f1   :  { %1150 = vperm.xlu1 %1877, %v1145_v58   ;;  %1124 = vperm.xlu0 %1868, %v1109_v59  }
0x18f9   :  { %1127 = vperm.xlu0 %1868, %v1110_v61   ;;  %1878 = vset.pattern.permute.xlu1 %v2049_v25 }
0x1953   :  { %v1119_v63 = vpop.permute.xlu0 %1118  ;;  %v1131_v3 = vpop.permute.xlu1 %1130 }
0x1954   :  { %v1132_v14 = vperm.slane %v1119_v63, %v2244_v35  ;;  %v1136_v12 = vperm.slane %v1131_v3, %v2244_v35 }
0x195b   :  { %v1122_v0 = vpop.permute.xlu0 %1121 }
0x195c   :  { %v1133_v2 = vperm.slane %v1122_v0, %v2244_v35 }
0x195e   :  { %v1137_v9 = vsel %vm898_vm3, %v1133_v2, %v1132_v14 }
0x1963   :  { %v1125_v1 = vpop.permute.xlu0 %1124  ;;  %v1151_v10 = vpop.permute.xlu1 %1150 }
0x1964   :  { %v1134_v48 = vperm.slane %v1125_v1, %v2244_v35 }
0x1966   :  { %v1138_v44 = vsel %vm900_vm4, %v1134_v48, %v1137_v9 }
0x196b   :  { %v1128_v4 = vpop.permute.xlu0 %1127 }
0x196c   :  { %v1135_v42 = vperm.slane %v1128_v4, %v2244_v35  ;;  %v2050_v4 = vmov 0.0  }
0x196e   :  { %v1139_v6 = vsel %vm902_vm5, %v1135_v42, %v1138_v44 }
0x196f   :  { %v1140_v7 = vsel %vm904_vm6, %v1136_v12, %v1139_v6 }
0x1970   :  { %v1142_v32 = vsel %vm813_vm1, %v1140_v7, -inf }
0x1971   :  { %1143 = vmax.xlane.f32.xlu0 %v1142_v32 }
0x19e4   :  { %v1144_v11 = vpop.xlane.xlu0 %1143 }
0x19e5   :  { %v2580_v13 = vadd.f32 %v1151_v10, %v1144_v11 }
0x19e7   :  { %v1155_v15 = vadd.f32 %v2580_v13, %v2420_v26  ;;  %v1154_v16 = vadd.f32 %v2580_v13, %v2422_v27  ;;  %v1156_v18 = vadd.f32 %v2580_v13, %v2424_v28  ;;  %v1158_v19 = vadd.f32 %v2580_v13, %v2436_v38 }
0x19e8   :  { %v1157_v21 = vadd.f32 %v2580_v13, %v2426_v31  ;;  %v1192_v26 = vperm.slane %v2414_v22, 7 }
0x19e9   :  { %1168 = vperm.xlu1 %1878, %v1155_v15   ;;  %1165 = vperm.xlu2 %1874, %v1154_v16  }
0x19f1   :  { %1171 = vperm.xlu1 %1878, %v1156_v18   ;;  %1177 = vperm.xlu2 %1874, %v1158_v19  }
0x19f9   :  { %1174 = vperm.xlu1 %1878, %v1157_v21   ;;  %1879 = vset.pattern.permute.xlu2 %v2387_v5 }
0x1a01   :  { %1197 = vperm.xlu2 %1879, %v1192_v26  }
0x1a09   :  { %1220 = vperm.xlu2 %1879, %v2244_v35  }
0x1a11   :  { %1880 = vset.pattern.permute.xlu2 %v2049_v25 }
0x1a43   :  { %v1166_v28 = vpop.permute.xlu2 %1165 }
0x1a44   :  { %v1179_v30 = vperm.slane %v1166_v28, %v2244_v35 }
0x1a4b   :  { %v1178_v31 = vpop.permute.xlu2 %1177 }
0x1a4c   :  { %v1183_v37 = vperm.slane %v1178_v31, %v2244_v35 }
0x1a5b   :  { %v1169_v27 = vpop.permute.xlu1 %1168  ;;  %v1198_v43 = vpop.permute.xlu2 %1197 }
0x1a5c   :  { %v1180_v24 = vperm.slane %v1169_v27, %v2244_v35 }
0x1a5e   :  { %v1184_v36 = vsel %vm898_vm3, %v1180_v24, %v1179_v30 }
0x1a63   :  { %v1172_v23 = vpop.permute.xlu1 %1171  ;;  %v2609_v59 = vpop.permute.xlu2 %1220 }
0x1a64   :  { %v1181_v29 = vperm.slane %v1172_v23, %v2244_v35 }
0x1a66   :  { %v1185_v39 = vsel %vm900_vm4, %v1181_v29, %v1184_v36 }
0x1a6b   :  { %v1175_v34 = vpop.permute.xlu1 %1174 }
0x1a6c   :  { %v1182_v22 = vperm.slane %v1175_v34, %v2244_v35 }
0x1a6e   :  { %v1186_v49 = vsel %vm902_vm5, %v1182_v22, %v1185_v39 }
0x1a6f   :  { %v1187_v40 = vsel %vm904_vm6, %v1183_v37, %v1186_v49 }
0x1a70   :  { %v1189_v41 = vsel %vm813_vm1, %v1187_v40, -inf }
0x1a71   :  { %1190 = vmax.xlane.f32.xlu1 %v1189_v41 }
0x1ae4   :  { %v1191_v45 = vpop.xlane.xlu1 %1190 }
0x1ae5   :  { %v1200_v46 = vadd.f32 %v1198_v43, %v1191_v45 }
0x1ae7   :  { %v1201_v47 = vadd.f32 %v1200_v46, %v2436_v38 }
0x1ae9   :  { %v1203_v50 = vsel %vm1202_vm7, %v1201_v47, -inf }
0x1aea   :  { %v1204_v51 = vrot.slane %v1203_v50, 4 }
0x1aec   :  { %v1205_v52 = vmax.f32 %v1203_v50, %v1204_v51 }
0x1aee   :  { %v1206_v53 = vrot.slane %v1205_v52, 2 }
0x1af0   :  { %v1207_v55 = vmax.f32 %v1205_v52, %v1206_v53 }
0x1af2   :  { %v1208_v56 = vrot.slane %v1207_v55, 1 }
0x1af4   :  { %v1209_v57 = vmax.f32 %v1207_v55, %v1208_v56 }
0x1af6   :  { %1212 = vperm.xlu0 %1868, %v1209_v57   ;;  %1746 = vst.msk [vmem:[#allocation6] sm:$0x1] %vm1745_vm12, %v1209_v57 }
0x1af7   :  { %1769 = dma.vmem_to_hbm [thread:$0]  %s1765_s22, 16, %s1767_s2, [#allocation7]  }
0x1b68   :  { %v1213_v58 = vpop.permute.xlu0 %1212 }
0x1b69   :  { %vm1215_vm8 = vcmp.eq.f32.partialorder %v1201_v47, %v1213_v58 }
0x1b6a   :  { %v1222_v61 = vsel %vm1215_vm8, %v2609_v59, 5 }
0x1b6b   :  { %v1223_v38 = vsel %vm1202_vm7, %v1222_v61, 2147483647 }
0x1b6c   :  { %v1224_v63 = vrot.slane %v1223_v38, 4 }
0x1b6e   :  { %vm1225_vm9 = vcmp.lt.s32.totalorder %v1223_v38, %v1224_v63 }
0x1b6f   :  { %v1226_v0 = vsel %vm1225_vm9, %v1223_v38, %v1224_v63 }
0x1b70   :  { %v1227_v1 = vrot.slane %v1226_v0, 2 }
0x1b72   :  { %vm1228_vm10 = vcmp.lt.s32.totalorder %v1226_v0, %v1227_v1 }
0x1b73   :  { %v1229_v2 = vsel %vm1228_vm10, %v1226_v0, %v1227_v1 }
0x1b74   :  { %v1230_v48 = vrot.slane %v1229_v2, 1 }
0x1b76   :  { %vm1231_vm11 = vcmp.lt.s32.totalorder %v1229_v2, %v1230_v48 }
0x1b77   :  { %v1232_v3 = vsel %vm1231_vm11, %v1229_v2, %v1230_v48 }
0x1b78   :  { %1235 = vperm.xlu2 %1880, %v1232_v3  }
0x1b80   :  { %1881 = vset.pattern.permute.xlu2 %v2387_v5 }
0x1bd2   :  { %v2614_v14 = vpop.permute.xlu2 %1235 }
0x1bd3   :  { %vm1238_vm14 = vcmp.eq.s32.totalorder %v2244_v35, %v2614_v14 }
0x1bd4   :  { %v1829_v9 = vsel %vm1238_vm14, 1.0, %v2050_v4 }
0x1bd5   :  { %1831 = vmatmul.msk.f32.vlgmr.msra.gmra.mxu2 %vm1241_vm13, %v1829_v9 }
0x1c58   :  { %v1264_v42 = vpop.f32.mrf.mxu2 }
0x1c59   :  { %v1268_v12 = vperm.slane %v1264_v42, 0 }
0x1c5b   :  { %1273 = vperm.xlu2 %1881, %v1268_v12  }
0x1c63   :  { %1882 = vset.pattern.permute.xlu2 %v2049_v25 }
0x1cb5   :  { %v1274_v44 = vpop.permute.xlu2 %1273 }
0x1cb6   :  { %v1276_v6 = vadd.f32 %v1274_v44, %v2580_v13 }
0x1cb8   :  { %v1277_v7 = vsel %vm1202_vm7, %v1276_v6, -inf }
0x1cb9   :  { %v1278_v32 = vrot.slane %v1277_v7, 4 }
0x1cbb   :  { %v1279_v10 = vmax.f32 %v1277_v7, %v1278_v32 }
0x1cbd   :  { %v1280_v11 = vrot.slane %v1279_v10, 2 }
0x1cbf   :  { %v1281_v15 = vmax.f32 %v1279_v10, %v1280_v11 }
0x1cc1   :  { %v1282_v16 = vrot.slane %v1281_v15, 1 }
0x1cc3   :  { %v1283_v18 = vmax.f32 %v1281_v15, %v1282_v16 }
0x1cc5   :  { %1286 = vperm.xlu0 %1868, %v1283_v18  }
0x1ccd   :  { %1883 = vset.pattern.permute.xlu0 %v2387_v5 }
0x1d37   :  { %v1287_v19 = vpop.permute.xlu0 %1286 }
0x1d38   :  { %vm1289_vm15 = vcmp.eq.f32.partialorder %v1276_v6, %v1287_v19 }
0x1d39   :  { %v1290_v21 = vsel %vm1289_vm15, %v2609_v59, 5 }
0x1d3a   :  { %v1291_v26 = vsel %vm1202_vm7, %v1290_v21, 2147483647 }
0x1d3b   :  { %v1292_v27 = vrot.slane %v1291_v26, 4 }
0x1d3d   :  { %vm1293_vm1 = vcmp.lt.s32.totalorder %v1291_v26, %v1292_v27 }
0x1d3e   :  { %v1294_v13 = vsel %vm1293_vm1, %v1291_v26, %v1292_v27 }
0x1d3f   :  { %v1295_v28 = vrot.slane %v1294_v13, 2 }
0x1d41   :  { %vm1296_vm2 = vcmp.lt.s32.totalorder %v1294_v13, %v1295_v28 }
0x1d42   :  { %v1297_v23 = vsel %vm1296_vm2, %v1294_v13, %v1295_v28 }
0x1d43   :  { %v1298_v24 = vrot.slane %v1297_v23, 1 }
0x1d45   :  { %vm1299_vm3 = vcmp.lt.s32.totalorder %v1297_v23, %v1298_v24 }
0x1d46   :  { %v1300_v29 = vsel %vm1299_vm3, %v1297_v23, %v1298_v24 }
0x1d47   :  { %1303 = vperm.xlu2 %1882, %v1300_v29  }
0x1da1   :  { %v2626_v30 = vpop.permute.xlu2 %1303 }
0x1da2   :  { %vm1306_vm4 = vcmp.eq.s32.totalorder %v2244_v35, %v2626_v30 }
0x1da3   :  { %v1832_v31 = vsel %vm1306_vm4, 1.0, %v2050_v4 }
0x1da4   :  { %1834 = vmatmul.msk.f32.vlgmr.msra.gmra.mxu3 %vm1241_vm13, %v1832_v31 }
0x1e27   :  { %v1329_v34 = vpop.f32.mrf.mxu3 }
0x1e28   :  { %v1333_v36 = vperm.slane %v1329_v34, 0 }
0x1e2a   :  { %1338 = vperm.xlu0 %1883, %v1333_v36  }
0x1e32   :  { %1885 = vset.pattern.permute.xlu0 %v2049_v25 }
0x1e9c   :  { %v1339_v22 = vpop.permute.xlu0 %1338 }
0x1e9d   :  { %v1341_v37 = vadd.f32 %v1339_v22, %v2555_v54 }
0x1e9f   :  { %v1342_v39 = vsel %vm1202_vm7, %v1341_v37, -inf }
0x1ea0   :  { %v1343_v49 = vrot.slane %v1342_v39, 4 }
0x1ea2   :  { %v1344_v40 = vmax.f32 %v1342_v39, %v1343_v49 }
0x1ea4   :  { %v1345_v41 = vrot.slane %v1344_v40, 2 }
0x1ea6   :  { %v1346_v43 = vmax.f32 %v1344_v40, %v1345_v41 }
0x1ea8   :  { %v1347_v45 = vrot.slane %v1346_v43, 1 }
0x1eaa   :  { %v1348_v46 = vmax.f32 %v1346_v43, %v1347_v45 }
0x1eac   :  { %1351 = vperm.xlu1 %1878, %v1348_v46  }
0x1eb4   :  { %1887 = vset.pattern.permute.xlu1 %v2387_v5 }
0x1f1e   :  { %v1352_v47 = vpop.permute.xlu1 %1351 }
0x1f1f   :  { %vm1354_vm5 = vcmp.eq.f32.partialorder %v1341_v37, %v1352_v47 }
0x1f20   :  { %v1355_v50 = vsel %vm1354_vm5, %v2609_v59, 5 }
0x1f21   :  { %v1356_v51 = vsel %vm1202_vm7, %v1355_v50, 2147483647 }
0x1f22   :  { %v1357_v52 = vrot.slane %v1356_v51, 4 }
0x1f24   :  { %vm1358_vm6 = vcmp.lt.s32.totalorder %v1356_v51, %v1357_v52 }
0x1f25   :  { %v1359_v54 = vsel %vm1358_vm6, %v1356_v51, %v1357_v52 }
0x1f26   :  { %v1360_v53 = vrot.slane %v1359_v54, 2 }
0x1f28   :  { %vm1361_vm8 = vcmp.lt.s32.totalorder %v1359_v54, %v1360_v53 }
0x1f29   :  { %v1362_v55 = vsel %vm1361_vm8, %v1359_v54, %v1360_v53 }
0x1f2a   :  { %v1363_v56 = vrot.slane %v1362_v55, 1 }
0x1f2c   :  { %vm1364_vm9 = vcmp.lt.s32.totalorder %v1362_v55, %v1363_v56 }
0x1f2d   :  { %v1365_v57 = vsel %vm1364_vm9, %v1362_v55, %v1363_v56 }
0x1f2e   :  { %1368 = vperm.xlu2 %1882, %v1365_v57  }
0x1f36   :  { %1884 = vset.pattern.permute.xlu2 %v2387_v5 }
0x1f88   :  { %v2639_v58 = vpop.permute.xlu2 %1368 }
0x1f89   :  { %vm1371_vm10 = vcmp.eq.s32.totalorder %v2244_v35, %v2639_v58 }
0x1f8a   :  { %v1835_v61 = vsel %vm1371_vm10, 1.0, %v2050_v4 }
0x1f8b   :  { %1837 = vmatmul.msk.f32.vlgmr.msrb.gmra.mxu0 %vm1241_vm13, %v1835_v61 }
0x2008   :  { %v1394_v38 = vpop.f32.mrf.mxu0 }
0x2009   :  { %v1398_v63 = vperm.slane %v1394_v38, 0 }
0x200b   :  { %1403 = vperm.xlu2 %1884, %v1398_v63  }
0x2013   :  { %1886 = vset.pattern.permute.xlu2 %v2049_v25 }
0x2065   :  { %v1404_v0 = vpop.permute.xlu2 %1403 }
0x2066   :  { %v1406_v1 = vadd.f32 %v1404_v0, %v2533_v17 }
0x2068   :  { %v1407_v2 = vsel %vm1202_vm7, %v1406_v1, -inf }
0x2069   :  { %v1408_v5 = vrot.slane %v1407_v2, 4 }
0x206b   :  { %v1409_v48 = vmax.f32 %v1407_v2, %v1408_v5 }
0x206d   :  { %v1410_v3 = vrot.slane %v1409_v48, 2 }
0x206f   :  { %v1411_v9 = vmax.f32 %v1409_v48, %v1410_v3 }
0x2071   :  { %v1412_v42 = vrot.slane %v1411_v9, 1 }
0x2073   :  { %v1413_v12 = vmax.f32 %v1411_v9, %v1412_v42 }
0x2075   :  { %1416 = vperm.xlu0 %1885, %v1413_v12  }
0x20e7   :  { %v1417_v44 = vpop.permute.xlu0 %1416 }
0x20e8   :  { %vm1419_vm11 = vcmp.eq.f32.partialorder %v1406_v1, %v1417_v44 }
0x20e9   :  { %v1420_v6 = vsel %vm1419_vm11, %v2609_v59, 5 }
0x20ea   :  { %v1421_v7 = vsel %vm1202_vm7, %v1420_v6, 2147483647 }
0x20eb   :  { %v1422_v32 = vrot.slane %v1421_v7, 4 }
0x20ed   :  { %vm1423_vm14 = vcmp.lt.s32.totalorder %v1421_v7, %v1422_v32 }
0x20ee   :  { %v1424_v25 = vsel %vm1423_vm14, %v1421_v7, %v1422_v32 }
0x20ef   :  { %v1425_v10 = vrot.slane %v1424_v25, 2 }
0x20f1   :  { %vm1426_vm15 = vcmp.lt.s32.totalorder %v1424_v25, %v1425_v10 }
0x20f2   :  { %v1427_v17 = vsel %vm1426_vm15, %v1424_v25, %v1425_v10 }
0x20f3   :  { %v1428_v11 = vrot.slane %v1427_v17, 1 }
0x20f5   :  { %vm1429_vm1 = vcmp.lt.s32.totalorder %v1427_v17, %v1428_v11 }
0x20f6   :  { %v1430_v15 = vsel %vm1429_vm1, %v1427_v17, %v1428_v11 }
0x20f7   :  { %1433 = vperm.xlu2 %1886, %v1430_v15  }
0x2151   :  { %v2650_v16 = vpop.permute.xlu2 %1433 }
0x2152   :  { %vm1436_vm2 = vcmp.eq.s32.totalorder %v2244_v35, %v2650_v16 }
0x2153   :  { %v1838_v18 = vsel %vm1436_vm2, 1.0, %v2050_v4 }
0x2154   :  { %1840 = vmatmul.msk.f32.vlgmr.msrb.gmra.mxu1 %vm1241_vm13, %v1838_v18 }
0x21d1   :  { %v1459_v19 = vpop.f32.mrf.mxu1 }
0x21d2   :  { %v1463_v21 = vperm.slane %v1459_v19, 0 }
0x21d4   :  { %1468 = vperm.xlu1 %1887, %v1463_v21  }
0x2246   :  { %v1469_v26 = vpop.permute.xlu1 %1468 }
0x2247   :  { %v1471_v27 = vadd.f32 %v1469_v26, %v2505_v60 }
0x2249   :  { %v1472_v13 = vsel %vm1202_vm7, %v1471_v27, -inf }
0x224a   :  { %v1473_v28 = vrot.slane %v1472_v13, 4 }
0x224c   :  { %v1474_v23 = vmax.f32 %v1472_v13, %v1473_v28 }
0x224e   :  { %v1475_v24 = vrot.slane %v1474_v23, 2 }
0x2250   :  { %v1476_v29 = vmax.f32 %v1474_v23, %v1475_v24 }
0x2252   :  { %v1477_v31 = vrot.slane %v1476_v29, 1 }
0x2254   :  { %v1478_v34 = vmax.f32 %v1476_v29, %v1477_v31 }
0x2256   :  { %1481 = vperm.xlu2 %1886, %v1478_v34  }
0x22b0   :  { %v1482_v36 = vpop.permute.xlu2 %1481 }
0x22b1   :  { %vm1484_vm3 = vcmp.eq.f32.partialorder %v1471_v27, %v1482_v36 }
0x22b2   :  { %v1485_v22 = vsel %vm1484_vm3, %v2609_v59, 5 }
0x22b3   :  { %v1486_v37 = vsel %vm1202_vm7, %v1485_v22, 2147483647 }
0x22b4   :  { %v1487_v39 = vrot.slane %v1486_v37, 4 }
0x22b6   :  { %vm1488_vm4 = vcmp.lt.s32.totalorder %v1486_v37, %v1487_v39 }
0x22b7   :  { %v1489_v49 = vsel %vm1488_vm4, %v1486_v37, %v1487_v39 }
0x22b8   :  { %v1490_v40 = vrot.slane %v1489_v49, 2 }
0x22ba   :  { %vm1491_vm5 = vcmp.lt.s32.totalorder %v1489_v49, %v1490_v40 }
0x22bb   :  { %v1492_v60 = vsel %vm1491_vm5, %v1489_v49, %v1490_v40 }
0x22bc   :  { %v1493_v41 = vrot.slane %v1492_v60, 1 }
0x22be   :  { %vm1494_vm6 = vcmp.lt.s32.totalorder %v1492_v60, %v1493_v41 }
0x22bf   :  { %v1495_v43 = vsel %vm1494_vm6, %v1492_v60, %v1493_v41 }
0x22c0   :  { %1497 = vperm.xlu0 %1885, %v1495_v43  }
0x2332   :  { %v2660_v45 = vpop.permute.xlu0 %1497 }
0x2333   :  { %vm1500_vm8 = vcmp.eq.s32.totalorder %v2244_v35, %v2660_v45 }
0x2334   :  { %v1841_v46 = vsel %vm1500_vm8, 1.0, %v2050_v4 }
0x2335   :  { %1843 = vmatmul.msk.f32.vlgmr.msrb.gmra.mxu2 %vm1241_vm13, %v1841_v46 }
0x23b8   :  { %v1523_v47 = vpop.f32.mrf.mxu2 }
0x23b9   :  { %v1527_v50 = vperm.slane %v1523_v47, 0 }
0x23bb   :  { %1532 = vperm.xlu1 %1887, %v1527_v50  }
0x242d   :  { %v1533_v51 = vpop.permute.xlu1 %1532 }
0x242e   :  { %v1535_v52 = vadd.f32 %v1533_v51, %v2480_v20 }
0x2430   :  { %v1536_v54 = vsel %vm1202_vm7, %v1535_v52, -inf }
0x2431   :  { %v1537_v53 = vrot.slane %v1536_v54, 4 }
0x2433   :  { %v1538_v55 = vmax.f32 %v1536_v54, %v1537_v53 }
0x2435   :  { %v1539_v56 = vrot.slane %v1538_v55, 2 }
0x2437   :  { %v1540_v57 = vmax.f32 %v1538_v55, %v1539_v56 }
0x2439   :  { %v1541_v61 = vrot.slane %v1540_v57, 1 }
0x243b   :  { %v1542_v38 = vmax.f32 %v1540_v57, %v1541_v61 }
0x243d   :  { %1545 = vperm.xlu2 %1886, %v1542_v38  }
0x2497   :  { %v1546_v63 = vpop.permute.xlu2 %1545 }
0x2498   :  { %vm1548_vm9 = vcmp.eq.f32.partialorder %v1535_v52, %v1546_v63 }
0x2499   :  { %v1549_v0 = vsel %vm1548_vm9, %v2609_v59, 5 }
0x249a   :  { %v1550_v1 = vsel %vm1202_vm7, %v1549_v0, 2147483647 }
0x249b   :  { %v1551_v2 = vrot.slane %v1550_v1, 4 }
0x249d   :  { %vm1552_vm10 = vcmp.lt.s32.totalorder %v1550_v1, %v1551_v2 }
0x249e   :  { %v1553_v5 = vsel %vm1552_vm10, %v1550_v1, %v1551_v2 }
0x249f   :  { %v1554_v48 = vrot.slane %v1553_v5, 2 }
0x24a1   :  { %vm1555_vm11 = vcmp.lt.s32.totalorder %v1553_v5, %v1554_v48 }
0x24a2   :  { %v1556_v20 = vsel %vm1555_vm11, %v1553_v5, %v1554_v48  ;;  %vm1233_vm11 = vcmp.eq.s32.totalorder %v2244_v35, 7 }
0x24a3   :  { %v1557_v3 = vrot.slane %v1556_v20, 1 }
0x24a5   :  { %vm1558_vm14 = vcmp.lt.s32.totalorder %v1556_v20, %v1557_v3 }
0x24a6   :  { %v1559_v9 = vsel %vm1558_vm14, %v1556_v20, %v1557_v3  ;;  %vm1301_vm14 = vcmp.eq.s32.totalorder %v2244_v35, 6 }
0x24a7   :  { %1562 = vperm.xlu0 %1885, %v1559_v9  }
0x2519   :  { %v2670_v42 = vpop.permute.xlu0 %1562 }
0x251a   :  { %vm1565_vm15 = vcmp.eq.s32.totalorder %v2244_v35, %v2670_v42 }
0x251b   :  { %v1844_v12 = vsel %vm1565_vm15, 1.0, %v2050_v4  ;;  %vm1366_vm15 = vcmp.eq.s32.totalorder %v2244_v35, 5 }
0x251c   :  { %1846 = vmatmul.msk.f32.vlgmr.msrb.gmra.mxu3 %vm1241_vm13, %v1844_v12 }
0x259f   :  { %v1588_v44 = vpop.f32.mrf.mxu3 }
0x25a0   :  { %v1592_v6 = vperm.slane %v1588_v44, 0 }
0x25a2   :  { %1597 = vperm.xlu1 %1887, %v1592_v6  }
0x2614   :  { %v1598_v7 = vpop.permute.xlu1 %1597 }
0x2615   :  { %v1600_v32 = vadd.f32 %v1598_v7, %v2455_v62 }
0x2617   :  { %v1601_v25 = vsel %vm1202_vm7, %v1600_v32, -inf }
0x2618   :  { %v1602_v10 = vrot.slane %v1601_v25, 4 }
0x261a   :  { %v1603_v17 = vmax.f32 %v1601_v25, %v1602_v10 }
0x261c   :  { %v1604_v11 = vrot.slane %v1603_v17, 2 }
0x261e   :  { %v1605_v15 = vmax.f32 %v1603_v17, %v1604_v11 }
0x2620   :  { %v1606_v18 = vrot.slane %v1605_v15, 1 }
0x2622   :  { %v1607_v19 = vmax.f32 %v1605_v15, %v1606_v18 }
0x2624   :  { %1610 = vperm.xlu2 %1886, %v1607_v19  }
0x267e   :  { %v1611_v21 = vpop.permute.xlu2 %1610 }
0x267f   :  { %vm1613_vm1 = vcmp.eq.f32.partialorder %v1600_v32, %v1611_v21 }
0x2680   :  { %v1614_v26 = vsel %vm1613_vm1, %v2609_v59, 5  ;;  %vm1560_vm1 = vcmp.eq.s32.totalorder %v2244_v35, 2 }
0x2681   :  { %v1615_v27 = vsel %vm1202_vm7, %v1614_v26, 2147483647 }
0x2682   :  { %v1616_v13 = vrot.slane %v1615_v27, 4 }
0x2684   :  { %vm1617_vm2 = vcmp.lt.s32.totalorder %v1615_v27, %v1616_v13 }
0x2685   :  { %v1618_v28 = vsel %vm1617_vm2, %v1615_v27, %v1616_v13  ;;  %vm1625_vm2 = vcmp.eq.s32.totalorder %v2244_v35, 1 }
0x2686   :  { %v1619_v23 = vrot.slane %v1618_v28, 2 }
0x2688   :  { %vm1620_vm3 = vcmp.lt.s32.totalorder %v1618_v28, %v1619_v23 }
0x2689   :  { %v1621_v62 = vsel %vm1620_vm3, %v1618_v28, %v1619_v23  ;;  %vm1690_vm3 = vcmp.eq.s32.totalorder %v2244_v35, 0 }
0x268a   :  { %v1622_v24 = vrot.slane %v1621_v62, 1 }
0x268c   :  { %vm1623_vm4 = vcmp.lt.s32.totalorder %v1621_v62, %v1622_v24 }
0x268d   :  { %v1624_v29 = vsel %vm1623_vm4, %v1621_v62, %v1622_v24  ;;  %vm1743_vm4 = vcmask 57344  }
0x268e   :  { %1627 = vperm.xlu0 %1885, %v1624_v29  }
0x2700   :  { %v1628_v31 = vpop.permute.xlu0 %1627 }
0x2701   :  { %vm1630_vm5 = vcmp.eq.s32.totalorder %v2244_v35, %v1628_v31 }
0x2702   :  { %v1847_v34 = vsel %vm1630_vm5, 1.0, %v2050_v4 }
0x2703   :  { %1849 = vmatmul.msk.f32.vlgmr.msra.gmra.mxu0 %vm1241_vm13, %v1847_v34 }
0x2780   :  { %v1653_v36 = vpop.f32.mrf.mxu0 }
0x2781   :  { %v1657_v22 = vperm.slane %v1653_v36, 0 }
0x2783   :  { %1662 = vperm.xlu1 %1887, %v1657_v22  }
0x27f5   :  { %v1663_v37 = vpop.permute.xlu1 %1662 }
0x27f6   :  { %v1665_v39 = vadd.f32 %v1663_v37, %v2428_v33 }
0x27f8   :  { %v1666_v49 = vsel %vm1202_vm7, %v1665_v39, -inf }
0x27f9   :  { %v1667_v40 = vrot.slane %v1666_v49, 4 }
0x27fb   :  { %v1668_v60 = vmax.f32 %v1666_v49, %v1667_v40 }
0x27fd   :  { %v1669_v41 = vrot.slane %v1668_v60, 2 }
0x27ff   :  { %v1670_v43 = vmax.f32 %v1668_v60, %v1669_v41 }
0x2801   :  { %v1671_v46 = vrot.slane %v1670_v43, 1 }
0x2803   :  { %v1672_v47 = vmax.f32 %v1670_v43, %v1671_v46 }
0x2805   :  { %1675 = vperm.xlu2 %1886, %v1672_v47  }
0x285f   :  { %v1676_v50 = vpop.permute.xlu2 %1675 }
0x2860   :  { %vm1678_vm6 = vcmp.eq.f32.partialorder %v1665_v39, %v1676_v50 }
0x2861   :  { %v1679_v51 = vsel %vm1678_vm6, %v2609_v59, 5  ;;  %v1237_v59 = vsel %vm1233_vm11, %v2614_v14, 0  ;;  %vm1722_vm6 = vcmask 32768  }
0x2862   :  { %v1680_v52 = vsel %vm1202_vm7, %v1679_v51, 2147483647  ;;  %vm1431_vm7 = vcmp.eq.s32.totalorder %v2244_v35, 4  ;;  %v1305_v61 = vsel %vm1301_vm14, %v2626_v30, %v1237_v59 }
0x2863   :  { %v1681_v54 = vrot.slane %v1680_v52, 4  ;;  %v1370_v38 = vsel %vm1366_vm15, %v2639_v58, %v1305_v61 }
0x2864   :  { %v1435_v63 = vsel %vm1431_vm7, %v2650_v16, %v1370_v38 }
0x2865   :  { %vm1682_vm8 = vcmp.lt.s32.totalorder %v1680_v52, %v1681_v54  ;;  %v1499_v0 = vsel %vm810_vm0, %v2660_v45, %v1435_v63 }
0x2866   :  { %v1683_v53 = vsel %vm1682_vm8, %v1680_v52, %v1681_v54  ;;  %v1564_v14 = vsel %vm1560_vm1, %v2670_v42, %v1499_v0 }
0x2867   :  { %v1684_v55 = vrot.slane %v1683_v53, 2  ;;  %v1629_v1 = vsel %vm1625_vm2, %v1628_v31, %v1564_v14 }
0x2869   :  { %vm1685_vm9 = vcmp.lt.s32.totalorder %v1683_v53, %v1684_v55 }
0x286a   :  { %v1686_v33 = vsel %vm1685_vm9, %v1683_v53, %v1684_v55 }
0x286b   :  { %v1687_v56 = vrot.slane %v1686_v33, 1 }
0x286d   :  { %vm1688_vm10 = vcmp.lt.s32.totalorder %v1686_v33, %v1687_v56 }
0x286e   :  { %v1689_v57 = vsel %vm1688_vm10, %v1686_v33, %v1687_v56 }
0x286f   :  { %1692 = vperm.xlu0 %1885, %v1689_v57  }
0x28e1   :  { %v1693_v2 = vpop.permute.xlu0 %1692 }
0x28e2   :  { %v1694_v30 = vsel %vm1690_vm3, %v1693_v2, %v1629_v1  ;;  %vm1695_vm5 = vcmp.eq.s32.totalorder %v2244_v35, %v1693_v2 }
0x28e3   :  { %v1850_v58 = vsel %vm1695_vm5, 1.0, %v2050_v4  ;;  %1744 = vst.msk [vmem:[#allocation5] sm:$0x1] %vm1743_vm4, %v1694_v30 }
0x28e4   :  { %1852 = vmatmul.msk.f32.vlgmr.msra.gmra.mxu1 %vm1241_vm13, %v1850_v58  ;;  %1758 = dma.vmem_to_hbm [thread:$0]  %s1754_s16, 16, %s1756_s19, [#allocation3]  }
0x2961   :  { %v1718_v16 = vpop.f32.mrf.mxu1 }
0x2962   :  { %v1721_v5 = vadd.f32 %v1718_v16, %v2395_v8 }
0x2964   :  { %v1723_v45 = vsel %vm1722_vm6, %v1721_v5, -inf }
0x2965   :  { %1724 = vmax.xlane.f32.xlu1 %v1723_v45 }
0x29d8   :  { %v1725_v48 = vpop.xlane.xlu1 %1724 }
0x29d9   :  { %vm1726_vm0 = vcmp.eq.f32.partialorder %v1721_v5, %v1725_v48 }
0x29da   :  { %v1727_v20 = vsel %vm1726_vm0, %v2244_v35, 5 }
0x29db   :  { %v1728_v3 = vsel %vm1722_vm6, %v1727_v20, 2147483647 }
0x29dc   :  { %v1730_v9 = vshra.s32 %v1728_v3, 16  ;;  %v1729_v4 = vand.u32 65535, %v1728_v3 }
0x29de   :  { %v1732_v42 = vcvt.s32.f32 %v1730_v9  ;;  %v1731_v8 = vcvt.s32.f32 %v1729_v4 }
0x29e0   :  { %1733 = vmin.xlane.f32.xlu2 %v1732_v42 }
0x2a53   :  { %v1734_v35 = vpop.xlane.xlu2 %1733 }
0x2a54   :  { %vm1735_vm13 = vcmp.eq.f32.partialorder %v1732_v42, %v1734_v35  ;;  %v1740_v44 = vcvt.f32.s32 %v1734_v35 }
0x2a55   :  { %v1736_v12 = vsel %vm1735_vm13, %v1731_v8, inf }
0x2a56   :  { %1737 = vmin.xlane.f32.xlu0 %v1736_v12  ;;  %v1741_v7 = vshll.u32 %v1740_v44, 16 }
0x2ac9   :  { %v1738_v6 = vpop.xlane.xlu0 %1737 }
0x2aca   :  { %v1739_v32 = vcvt.f32.s32 %v1738_v6 }
0x2acc   :  { %v1742_v25 = vadd.s32 %v1741_v7, %v1739_v32 }
0x2ace   :  { %1747 = vst.msk [vmem:[#allocation8] sm:$0x1] %vm1745_vm12, %v1742_v25 }
0x2acf   :  { %1780 = dma.vmem_to_hbm [thread:$0]  %s1776_s1, 16, %s1778_s17, [#allocation7]  }
0x2ad0   :  { %2041 = dma.done.wait [#allocation3], 16  }
0x2ad1   :  { %2042 = vsyncadd [#allocation3], 4294967280 }
0x2ad2   :  { %2043 = dma.done.wait [#allocation7], 32  }
0x2ad3   :  { %2044 = vsyncadd [#allocation7], 4294967264 }
0x2ad4   :  { %1793 = vsyncpa [#allocation3], 1 }
0x2ad5   :  { %1794 = vsyncpa [#allocation7], 1 }
0x2ad6   :  { %1795 = vsyncpa [#allocation4], 1 }

</bundles_post_ra>
